<compile_context>
chip_gen: v7x
topology: tpu7x:2x2x1
jax: 0.10.0
libtpu: 0.0.40
codegen_flags: <defaults>
</compile_context>

<pallas_src>
import jax
import jax.numpy as jnp
from jax import lax
from jax.experimental import pallas as pl
from jax.experimental.pallas import tpu as pltpu


_UNROLL = 8  # per-step unroll of the recurrence (full unroll when seq_len <= 8)


def lstm_kernel(x_ref, wih_ref, whh_ref, b_ref, wlin_ref, blin_ref,
                out_ref, gx_ref):
    """Full LSTM recurrence over the sequence + final linear layer."""
    Hp = whh_ref.shape[0]          # padded hidden size (multiple of 128)
    seq_len = x_ref.shape[0]

    # Hoisted input projection + combined bias: one bf16 MXU matmul, f32 acc.
    # Stored once to VMEM scratch; the loop reads one row per step.
    gx_ref[...] = (jnp.dot(x_ref[...], wih_ref[...],
                           preferred_element_type=jnp.float32)
                   + b_ref[...])                              # (seq_len, 4Hp) f32

    def step(t, carry):
        h, c = carry                                          # (1, Hp) f32 each
        # Only the recurrent matmul sits on the serial critical path.
        gates = gx_ref[pl.ds(t, 1), :] + jnp.dot(
            h.astype(jnp.bfloat16), whh_ref[...],
            preferred_element_type=jnp.float32)               # (1, 4Hp) f32
        # Gate order [i, f, o, g]: one fused sigmoid launch + one tanh launch.
        ifo = jax.nn.sigmoid(gates[:, :3 * Hp])
        g = jnp.tanh(gates[:, 3 * Hp:])
        i = ifo[:, 0 * Hp:1 * Hp]
        f = ifo[:, 1 * Hp:2 * Hp]
        o = ifo[:, 2 * Hp:3 * Hp]
        c = f * c + i * g
        h = o * jnp.tanh(c)
        return h, c

    h0 = jnp.zeros((1, Hp), jnp.float32)
    c0 = jnp.zeros((1, Hp), jnp.float32)
    h, _ = lax.fori_loop(0, seq_len, step, (h0, c0),
                         unroll=min(seq_len, _UNROLL))

    # predictions[-1]: one-off linear layer on the last hidden state.
    # Elementwise mul + lane reduce; padded lanes of w_lin are zero (exact).
    out_ref[...] = (jnp.sum(h * wlin_ref[...], axis=-1, keepdims=True)
                    + blin_ref[...])


def lstm_forward(x, w_ih, w_hh, b_ih, b_hh, w_lin, b_lin):
    """x: (seq_len, input_size). Weights in PyTorch layout:
       w_ih (4H, in), w_hh (4H, H), b_ih/b_hh (4H,), w_lin (1, H), b_lin (1,).
       Returns (1,) == predictions[-1]."""
    seq_len, input_size = x.shape
    H = w_hh.shape[1]
    Hp = ((H + 127) // 128) * 128          # pad each gate block to 128 lanes

    w_ih = jnp.asarray(w_ih, jnp.float32)
    w_hh = jnp.asarray(w_hh, jnp.float32)
    bias = jnp.asarray(b_ih, jnp.float32) + jnp.asarray(b_hh, jnp.float32)

    # PyTorch gate order along the 4H axis is [i, f, g, o]; reorder to
    # [i, f, o, g] (sigmoid gates contiguous) and zero-pad each gate block.
    perm = jnp.array([0, 1, 3, 2])

    def prep_gate_axis(w):
        w4 = w.reshape((4, H) + w.shape[1:])[perm]
        pad = [(0, 0)] * w4.ndim
        pad[1] = (0, Hp - H)
        return jnp.pad(w4, pad).reshape((4 * Hp,) + w.shape[1:])

    wih_t = prep_gate_axis(w_ih).T.astype(jnp.bfloat16)            # (in, 4Hp)
    whh_p = jnp.pad(prep_gate_axis(w_hh), ((0, 0), (0, Hp - H)))   # (4Hp, Hp)
    whh_t = whh_p.T.astype(jnp.bfloat16)                           # (Hp, 4Hp)
    bias_p = prep_gate_axis(bias).reshape(1, 4 * Hp)               # (1, 4Hp) f32

    wlin_p = jnp.pad(jnp.asarray(w_lin, jnp.float32),
                     ((0, 0), (0, Hp - H)))                        # (1, Hp) f32
    blin = jnp.asarray(b_lin, jnp.float32).reshape(1, 1)

    vmem = pl.BlockSpec(memory_space=pltpu.MemorySpace.VMEM)
    out = pl.pallas_call(
        lstm_kernel,
        out_shape=jax.ShapeDtypeStruct((1, 1), jnp.float32),
        in_specs=[vmem] * 6,
        out_specs=vmem,
        scratch_shapes=[pltpu.VMEM((seq_len, 4 * Hp), jnp.float32)],
    )(x.astype(jnp.bfloat16), wih_t, whh_t, bias_p, wlin_p, blin)
    return out.reshape(1)   # matches torch predictions[-1] shape (output_size,)


def lstm_reference(x, w_ih, w_hh, b_ih, b_hh, w_lin, b_lin,
                   matmul_dtype=jnp.float32):
    """Pure-JAX reference mirroring torch.nn.LSTM (batch=1, zero init) +
       nn.Linear.  matmul_dtype lets us mirror the kernel's bf16 MXU operands
       while keeping f32 accumulation and f32 elementwise math."""
    H = w_hh.shape[1]
    cast = lambda a: a.astype(matmul_dtype)
    gx = (jnp.dot(cast(x), cast(w_ih.T), preferred_element_type=jnp.float32)
          + b_ih + b_hh)
    h = jnp.zeros((1, H), jnp.float32)
    c = jnp.zeros((1, H), jnp.float32)
    for t in range(x.shape[0]):
        gates = gx[t:t + 1] + jnp.dot(cast(h), cast(w_hh.T),
                                      preferred_element_type=jnp.float32)
        i = jax.nn.sigmoid(gates[:, 0 * H:1 * H])
        f = jax.nn.sigmoid(gates[:, 1 * H:2 * H])
        g = jnp.tanh(gates[:, 2 * H:3 * H])
        o = jax.nn.sigmoid(gates[:, 3 * H:4 * H])
        c = f * c + i * g
        h = o * jnp.tanh(c)
    pred = jnp.sum(h * w_lin, axis=-1, keepdims=True) + b_lin
    return pred.reshape(-1)


if __name__ == "__main__":
    SEQ_LEN = 8
    INPUT_SIZE = 8
    HIDDEN = 32       # stands in for HIDDEN_LAYER_SIZE=100 at small test size
    OUTPUT_SIZE = 1

    key = jax.random.PRNGKey(0)
    ks = jax.random.split(key, 7)
    bound = 1.0 / jnp.sqrt(HIDDEN)

    x = jax.random.normal(ks[0], (SEQ_LEN, INPUT_SIZE), jnp.float32)
    w_ih = jax.random.uniform(ks[1], (4 * HIDDEN, INPUT_SIZE), jnp.float32,
                              -bound, bound)
    w_hh = jax.random.uniform(ks[2], (4 * HIDDEN, HIDDEN), jnp.float32,
                              -bound, bound)
    b_ih = jax.random.uniform(ks[3], (4 * HIDDEN,), jnp.float32, -bound, bound)
    b_hh = jax.random.uniform(ks[4], (4 * HIDDEN,), jnp.float32, -bound, bound)
    w_lin = jax.random.uniform(ks[5], (OUTPUT_SIZE, HIDDEN), jnp.float32,
                               -bound, bound)
    b_lin = jax.random.uniform(ks[6], (OUTPUT_SIZE,), jnp.float32,
                               -bound, bound)

    out = jax.block_until_ready(
        lstm_forward(x, w_ih, w_hh, b_ih, b_hh, w_lin, b_lin))
    assert out.shape == (OUTPUT_SIZE,)

    # Tight check against a reference that mirrors the kernel's bf16 MXU
    # operands (f32 accumulation): differences are accumulation-order /
    # transcendental-approximation noise only.
    ref_bf16 = lstm_reference(x, w_ih, w_hh, b_ih, b_hh, w_lin, b_lin,
                              matmul_dtype=jnp.bfloat16)
    assert jnp.allclose(out, ref_bf16, atol=1e-3, rtol=1e-3), (out, ref_bf16)

    # Looser sanity check against the full-f32 reference (bounds the effect of
    # the bf16 operand rounding on the final prediction).
    ref_f32 = lstm_reference(x, w_ih, w_hh, b_ih, b_hh, w_lin, b_lin)
    assert jnp.allclose(out, ref_f32, atol=5e-2, rtol=5e-2), (out, ref_f32)

    print("KERNEL_OK")
</pallas_src>

<mosaic_0001>
module attributes {stable_mosaic.version = 11 : i64} {
  func.func @lstm_kernel(%arg0: memref<8x8xbf16, #tpu.memory_space<vmem>>, %arg1: memref<8x512xbf16, #tpu.memory_space<vmem>>, %arg2: memref<128x512xbf16, #tpu.memory_space<vmem>>, %arg3: memref<1x512xf32, #tpu.memory_space<vmem>>, %arg4: memref<1x128xf32, #tpu.memory_space<vmem>>, %arg5: memref<1x1xf32, #tpu.memory_space<vmem>>, %arg6: memref<1x1xf32, #tpu.memory_space<vmem>>, %arg7: memref<8x512xf32, #tpu.memory_space<vmem>>) attributes {dimension_semantics = [], scalar_prefetch = 0 : i64, scratch_operands = 1 : i64, tpu.core_type = #tpu.core_type<tc>} {
    %c0 = arith.constant 0 : index
    %c0_0 = arith.constant 0 : index
    %0 = vector.load %arg0[%c0, %c0_0] : memref<8x8xbf16, #tpu.memory_space<vmem>>, vector<8x8xbf16>
    %c0_1 = arith.constant 0 : index
    %c0_2 = arith.constant 0 : index
    %1 = vector.load %arg1[%c0_1, %c0_2] : memref<8x512xbf16, #tpu.memory_space<vmem>>, vector<8x512xbf16>
    %cst = arith.constant dense<0.000000e+00> : vector<8x512xf32>
    %2 = tpu.matmul %0, %1, %cst {dimension_numbers = #tpu.dot_dimension_numbers<[1], [0], [0], [1], [0, 0, 1, 1], [], []>} : vector<8x8xbf16>, vector<8x512xbf16>, vector<8x512xf32> -> vector<8x512xf32>
    %c0_3 = arith.constant 0 : index
    %c0_4 = arith.constant 0 : index
    %3 = vector.load %arg3[%c0_3, %c0_4] : memref<1x512xf32, #tpu.memory_space<vmem>>, vector<1x512xf32>
    %4 = vector.broadcast %3 : vector<1x512xf32> to vector<8x512xf32>
    %5 = arith.addf %2, %4 : vector<8x512xf32>
    %c0_5 = arith.constant 0 : index
    %c0_6 = arith.constant 0 : index
    %6 = vector.load %arg7[%c0_5, %c0_6] : memref<8x512xf32, #tpu.memory_space<vmem>>, vector<8x512xf32>
    tpu.vector_store %arg7[%c0_5, %c0_6], %5 {strides = array<i32>} : memref<8x512xf32, #tpu.memory_space<vmem>>, vector<8x512xf32>,
    %cst_7 = arith.constant 0.000000e+00 : f32
    %7 = vector.broadcast %cst_7 : f32 to vector<1x128xf32>
    %cst_8 = arith.constant 0.000000e+00 : f32
    %8 = vector.broadcast %cst_8 : f32 to vector<1x128xf32>
    %c0_i32 = arith.constant 0 : i32
    %9 = arith.index_cast %c0_i32 : i32 to index
    %c0_9 = arith.constant 0 : index
    %10 = vector.load %arg7[%9, %c0_9] : memref<8x512xf32, #tpu.memory_space<vmem>>, vector<1x512xf32>
    %11 = arith.truncf %7 : vector<1x128xf32> to vector<1x128xbf16>
    %c0_10 = arith.constant 0 : index
    %c0_11 = arith.constant 0 : index
    %12 = vector.load %arg2[%c0_10, %c0_11] : memref<128x512xbf16, #tpu.memory_space<vmem>>, vector<128x512xbf16>
    %cst_12 = arith.constant dense<0.000000e+00> : vector<1x512xf32>
    %13 = tpu.matmul %11, %12, %cst_12 {dimension_numbers = #tpu.dot_dimension_numbers<[1], [0], [0], [1], [0, 0, 1, 1], [], []>} : vector<1x128xbf16>, vector<128x512xbf16>, vector<1x512xf32> -> vector<1x512xf32>
    %14 = arith.addf %10, %13 : vector<1x512xf32>
    %15 = vector.extract_strided_slice %14 {offsets = [0, 0], sizes = [1, 384], strides = [1, 1]} : vector<1x512xf32> to vector<1x384xf32>
    %16 = arith.negf %15 : vector<1x384xf32>
    %17 = math.exp %16 : vector<1x384xf32>
    %cst_13 = arith.constant 1.000000e+00 : f32
    %18 = vector.broadcast %cst_13 : f32 to vector<1x384xf32>
    %19 = arith.addf %18, %17 : vector<1x384xf32>
    %20 = arith.divf %18, %19 : vector<1x384xf32>
    %21 = vector.extract_strided_slice %14 {offsets = [0, 384], sizes = [1, 128], strides = [1, 1]} : vector<1x512xf32> to vector<1x128xf32>
    %22 = math.tanh %21 : vector<1x128xf32>
    %23 = vector.extract_strided_slice %20 {offsets = [0, 0], sizes = [1, 128], strides = [1, 1]} : vector<1x384xf32> to vector<1x128xf32>
    %24 = vector.extract_strided_slice %20 {offsets = [0, 128], sizes = [1, 128], strides = [1, 1]} : vector<1x384xf32> to vector<1x128xf32>
    %25 = vector.extract_strided_slice %20 {offsets = [0, 256], sizes = [1, 128], strides = [1, 1]} : vector<1x384xf32> to vector<1x128xf32>
    %26 = arith.mulf %24, %8 : vector<1x128xf32>
    %27 = arith.mulf %23, %22 : vector<1x128xf32>
    %28 = arith.addf %26, %27 : vector<1x128xf32>
    %29 = math.tanh %28 : vector<1x128xf32>
    %30 = arith.mulf %25, %29 : vector<1x128xf32>
    %c1_i32 = arith.constant 1 : i32
    %31 = arith.index_cast %c1_i32 : i32 to index
    %c0_14 = arith.constant 0 : index
    %32 = vector.load %arg7[%31, %c0_14] : memref<8x512xf32, #tpu.memory_space<vmem>>, vector<1x512xf32>
    %33 = arith.truncf %30 : vector<1x128xf32> to vector<1x128xbf16>
    %c0_15 = arith.constant 0 : index
    %c0_16 = arith.constant 0 : index
    %34 = vector.load %arg2[%c0_15, %c0_16] : memref<128x512xbf16, #tpu.memory_space<vmem>>, vector<128x512xbf16>
    %cst_17 = arith.constant dense<0.000000e+00> : vector<1x512xf32>
    %35 = tpu.matmul %33, %34, %cst_17 {dimension_numbers = #tpu.dot_dimension_numbers<[1], [0], [0], [1], [0, 0, 1, 1], [], []>} : vector<1x128xbf16>, vector<128x512xbf16>, vector<1x512xf32> -> vector<1x512xf32>
    %36 = arith.addf %32, %35 : vector<1x512xf32>
    %37 = vector.extract_strided_slice %36 {offsets = [0, 0], sizes = [1, 384], strides = [1, 1]} : vector<1x512xf32> to vector<1x384xf32>
    %38 = arith.negf %37 : vector<1x384xf32>
    %39 = math.exp %38 : vector<1x384xf32>
    %cst_18 = arith.constant 1.000000e+00 : f32
    %40 = vector.broadcast %cst_18 : f32 to vector<1x384xf32>
    %41 = arith.addf %40, %39 : vector<1x384xf32>
    %42 = arith.divf %40, %41 : vector<1x384xf32>
    %43 = vector.extract_strided_slice %36 {offsets = [0, 384], sizes = [1, 128], strides = [1, 1]} : vector<1x512xf32> to vector<1x128xf32>
    %44 = math.tanh %43 : vector<1x128xf32>
    %45 = vector.extract_strided_slice %42 {offsets = [0, 0], sizes = [1, 128], strides = [1, 1]} : vector<1x384xf32> to vector<1x128xf32>
    %46 = vector.extract_strided_slice %42 {offsets = [0, 128], sizes = [1, 128], strides = [1, 1]} : vector<1x384xf32> to vector<1x128xf32>
    %47 = vector.extract_strided_slice %42 {offsets = [0, 256], sizes = [1, 128], strides = [1, 1]} : vector<1x384xf32> to vector<1x128xf32>
    %48 = arith.mulf %46, %28 : vector<1x128xf32>
    %49 = arith.mulf %45, %44 : vector<1x128xf32>
    %50 = arith.addf %48, %49 : vector<1x128xf32>
    %51 = math.tanh %50 : vector<1x128xf32>
    %52 = arith.mulf %47, %51 : vector<1x128xf32>
    %c2_i32 = arith.constant 2 : i32
    %53 = arith.index_cast %c2_i32 : i32 to index
    %c0_19 = arith.constant 0 : index
    %54 = vector.load %arg7[%53, %c0_19] : memref<8x512xf32, #tpu.memory_space<vmem>>, vector<1x512xf32>
    %55 = arith.truncf %52 : vector<1x128xf32> to vector<1x128xbf16>
    %c0_20 = arith.constant 0 : index
    %c0_21 = arith.constant 0 : index
    %56 = vector.load %arg2[%c0_20, %c0_21] : memref<128x512xbf16, #tpu.memory_space<vmem>>, vector<128x512xbf16>
    %cst_22 = arith.constant dense<0.000000e+00> : vector<1x512xf32>
    %57 = tpu.matmul %55, %56, %cst_22 {dimension_numbers = #tpu.dot_dimension_numbers<[1], [0], [0], [1], [0, 0, 1, 1], [], []>} : vector<1x128xbf16>, vector<128x512xbf16>, vector<1x512xf32> -> vector<1x512xf32>
    %58 = arith.addf %54, %57 : vector<1x512xf32>
    %59 = vector.extract_strided_slice %58 {offsets = [0, 0], sizes = [1, 384], strides = [1, 1]} : vector<1x512xf32> to vector<1x384xf32>
    %60 = arith.negf %59 : vector<1x384xf32>
    %61 = math.exp %60 : vector<1x384xf32>
    %cst_23 = arith.constant 1.000000e+00 : f32
    %62 = vector.broadcast %cst_23 : f32 to vector<1x384xf32>
    %63 = arith.addf %62, %61 : vector<1x384xf32>
    %64 = arith.divf %62, %63 : vector<1x384xf32>
    %65 = vector.extract_strided_slice %58 {offsets = [0, 384], sizes = [1, 128], strides = [1, 1]} : vector<1x512xf32> to vector<1x128xf32>
    %66 = math.tanh %65 : vector<1x128xf32>
    %67 = vector.extract_strided_slice %64 {offsets = [0, 0], sizes = [1, 128], strides = [1, 1]} : vector<1x384xf32> to vector<1x128xf32>
    %68 = vector.extract_strided_slice %64 {offsets = [0, 128], sizes = [1, 128], strides = [1, 1]} : vector<1x384xf32> to vector<1x128xf32>
    %69 = vector.extract_strided_slice %64 {offsets = [0, 256], sizes = [1, 128], strides = [1, 1]} : vector<1x384xf32> to vector<1x128xf32>
    %70 = arith.mulf %68, %50 : vector<1x128xf32>
    %71 = arith.mulf %67, %66 : vector<1x128xf32>
    %72 = arith.addf %70, %71 : vector<1x128xf32>
    %73 = math.tanh %72 : vector<1x128xf32>
    %74 = arith.mulf %69, %73 : vector<1x128xf32>
    %c3_i32 = arith.constant 3 : i32
    %75 = arith.index_cast %c3_i32 : i32 to index
    %c0_24 = arith.constant 0 : index
    %76 = vector.load %arg7[%75, %c0_24] : memref<8x512xf32, #tpu.memory_space<vmem>>, vector<1x512xf32>
    %77 = arith.truncf %74 : vector<1x128xf32> to vector<1x128xbf16>
    %c0_25 = arith.constant 0 : index
    %c0_26 = arith.constant 0 : index
    %78 = vector.load %arg2[%c0_25, %c0_26] : memref<128x512xbf16, #tpu.memory_space<vmem>>, vector<128x512xbf16>
    %cst_27 = arith.constant dense<0.000000e+00> : vector<1x512xf32>
    %79 = tpu.matmul %77, %78, %cst_27 {dimension_numbers = #tpu.dot_dimension_numbers<[1], [0], [0], [1], [0, 0, 1, 1], [], []>} : vector<1x128xbf16>, vector<128x512xbf16>, vector<1x512xf32> -> vector<1x512xf32>
    %80 = arith.addf %76, %79 : vector<1x512xf32>
    %81 = vector.extract_strided_slice %80 {offsets = [0, 0], sizes = [1, 384], strides = [1, 1]} : vector<1x512xf32> to vector<1x384xf32>
    %82 = arith.negf %81 : vector<1x384xf32>
    %83 = math.exp %82 : vector<1x384xf32>
    %cst_28 = arith.constant 1.000000e+00 : f32
    %84 = vector.broadcast %cst_28 : f32 to vector<1x384xf32>
    %85 = arith.addf %84, %83 : vector<1x384xf32>
    %86 = arith.divf %84, %85 : vector<1x384xf32>
    %87 = vector.extract_strided_slice %80 {offsets = [0, 384], sizes = [1, 128], strides = [1, 1]} : vector<1x512xf32> to vector<1x128xf32>
    %88 = math.tanh %87 : vector<1x128xf32>
    %89 = vector.extract_strided_slice %86 {offsets = [0, 0], sizes = [1, 128], strides = [1, 1]} : vector<1x384xf32> to vector<1x128xf32>
    %90 = vector.extract_strided_slice %86 {offsets = [0, 128], sizes = [1, 128], strides = [1, 1]} : vector<1x384xf32> to vector<1x128xf32>
    %91 = vector.extract_strided_slice %86 {offsets = [0, 256], sizes = [1, 128], strides = [1, 1]} : vector<1x384xf32> to vector<1x128xf32>
    %92 = arith.mulf %90, %72 : vector<1x128xf32>
    %93 = arith.mulf %89, %88 : vector<1x128xf32>
    %94 = arith.addf %92, %93 : vector<1x128xf32>
    %95 = math.tanh %94 : vector<1x128xf32>
    %96 = arith.mulf %91, %95 : vector<1x128xf32>
    %c4_i32 = arith.constant 4 : i32
    %97 = arith.index_cast %c4_i32 : i32 to index
    %c0_29 = arith.constant 0 : index
    %98 = vector.load %arg7[%97, %c0_29] : memref<8x512xf32, #tpu.memory_space<vmem>>, vector<1x512xf32>
    %99 = arith.truncf %96 : vector<1x128xf32> to vector<1x128xbf16>
    %c0_30 = arith.constant 0 : index
    %c0_31 = arith.constant 0 : index
    %100 = vector.load %arg2[%c0_30, %c0_31] : memref<128x512xbf16, #tpu.memory_space<vmem>>, vector<128x512xbf16>
    %cst_32 = arith.constant dense<0.000000e+00> : vector<1x512xf32>
    %101 = tpu.matmul %99, %100, %cst_32 {dimension_numbers = #tpu.dot_dimension_numbers<[1], [0], [0], [1], [0, 0, 1, 1], [], []>} : vector<1x128xbf16>, vector<128x512xbf16>, vector<1x512xf32> -> vector<1x512xf32>
    %102 = arith.addf %98, %101 : vector<1x512xf32>
    %103 = vector.extract_strided_slice %102 {offsets = [0, 0], sizes = [1, 384], strides = [1, 1]} : vector<1x512xf32> to vector<1x384xf32>
    %104 = arith.negf %103 : vector<1x384xf32>
    %105 = math.exp %104 : vector<1x384xf32>
    %cst_33 = arith.constant 1.000000e+00 : f32
    %106 = vector.broadcast %cst_33 : f32 to vector<1x384xf32>
    %107 = arith.addf %106, %105 : vector<1x384xf32>
    %108 = arith.divf %106, %107 : vector<1x384xf32>
    %109 = vector.extract_strided_slice %102 {offsets = [0, 384], sizes = [1, 128], strides = [1, 1]} : vector<1x512xf32> to vector<1x128xf32>
    %110 = math.tanh %109 : vector<1x128xf32>
    %111 = vector.extract_strided_slice %108 {offsets = [0, 0], sizes = [1, 128], strides = [1, 1]} : vector<1x384xf32> to vector<1x128xf32>
    %112 = vector.extract_strided_slice %108 {offsets = [0, 128], sizes = [1, 128], strides = [1, 1]} : vector<1x384xf32> to vector<1x128xf32>
    %113 = vector.extract_strided_slice %108 {offsets = [0, 256], sizes = [1, 128], strides = [1, 1]} : vector<1x384xf32> to vector<1x128xf32>
    %114 = arith.mulf %112, %94 : vector<1x128xf32>
    %115 = arith.mulf %111, %110 : vector<1x128xf32>
    %116 = arith.addf %114, %115 : vector<1x128xf32>
    %117 = math.tanh %116 : vector<1x128xf32>
    %118 = arith.mulf %113, %117 : vector<1x128xf32>
    %c5_i32 = arith.constant 5 : i32
    %119 = arith.index_cast %c5_i32 : i32 to index
    %c0_34 = arith.constant 0 : index
    %120 = vector.load %arg7[%119, %c0_34] : memref<8x512xf32, #tpu.memory_space<vmem>>, vector<1x512xf32>
    %121 = arith.truncf %118 : vector<1x128xf32> to vector<1x128xbf16>
    %c0_35 = arith.constant 0 : index
    %c0_36 = arith.constant 0 : index
    %122 = vector.load %arg2[%c0_35, %c0_36] : memref<128x512xbf16, #tpu.memory_space<vmem>>, vector<128x512xbf16>
    %cst_37 = arith.constant dense<0.000000e+00> : vector<1x512xf32>
    %123 = tpu.matmul %121, %122, %cst_37 {dimension_numbers = #tpu.dot_dimension_numbers<[1], [0], [0], [1], [0, 0, 1, 1], [], []>} : vector<1x128xbf16>, vector<128x512xbf16>, vector<1x512xf32> -> vector<1x512xf32>
    %124 = arith.addf %120, %123 : vector<1x512xf32>
    %125 = vector.extract_strided_slice %124 {offsets = [0, 0], sizes = [1, 384], strides = [1, 1]} : vector<1x512xf32> to vector<1x384xf32>
    %126 = arith.negf %125 : vector<1x384xf32>
    %127 = math.exp %126 : vector<1x384xf32>
    %cst_38 = arith.constant 1.000000e+00 : f32
    %128 = vector.broadcast %cst_38 : f32 to vector<1x384xf32>
    %129 = arith.addf %128, %127 : vector<1x384xf32>
    %130 = arith.divf %128, %129 : vector<1x384xf32>
    %131 = vector.extract_strided_slice %124 {offsets = [0, 384], sizes = [1, 128], strides = [1, 1]} : vector<1x512xf32> to vector<1x128xf32>
    %132 = math.tanh %131 : vector<1x128xf32>
    %133 = vector.extract_strided_slice %130 {offsets = [0, 0], sizes = [1, 128], strides = [1, 1]} : vector<1x384xf32> to vector<1x128xf32>
    %134 = vector.extract_strided_slice %130 {offsets = [0, 128], sizes = [1, 128], strides = [1, 1]} : vector<1x384xf32> to vector<1x128xf32>
    %135 = vector.extract_strided_slice %130 {offsets = [0, 256], sizes = [1, 128], strides = [1, 1]} : vector<1x384xf32> to vector<1x128xf32>
    %136 = arith.mulf %134, %116 : vector<1x128xf32>
    %137 = arith.mulf %133, %132 : vector<1x128xf32>
    %138 = arith.addf %136, %137 : vector<1x128xf32>
    %139 = math.tanh %138 : vector<1x128xf32>
    %140 = arith.mulf %135, %139 : vector<1x128xf32>
    %c6_i32 = arith.constant 6 : i32
    %141 = arith.index_cast %c6_i32 : i32 to index
    %c0_39 = arith.constant 0 : index
    %142 = vector.load %arg7[%141, %c0_39] : memref<8x512xf32, #tpu.memory_space<vmem>>, vector<1x512xf32>
    %143 = arith.truncf %140 : vector<1x128xf32> to vector<1x128xbf16>
    %c0_40 = arith.constant 0 : index
    %c0_41 = arith.constant 0 : index
    %144 = vector.load %arg2[%c0_40, %c0_41] : memref<128x512xbf16, #tpu.memory_space<vmem>>, vector<128x512xbf16>
    %cst_42 = arith.constant dense<0.000000e+00> : vector<1x512xf32>
    %145 = tpu.matmul %143, %144, %cst_42 {dimension_numbers = #tpu.dot_dimension_numbers<[1], [0], [0], [1], [0, 0, 1, 1], [], []>} : vector<1x128xbf16>, vector<128x512xbf16>, vector<1x512xf32> -> vector<1x512xf32>
    %146 = arith.addf %142, %145 : vector<1x512xf32>
    %147 = vector.extract_strided_slice %146 {offsets = [0, 0], sizes = [1, 384], strides = [1, 1]} : vector<1x512xf32> to vector<1x384xf32>
    %148 = arith.negf %147 : vector<1x384xf32>
    %149 = math.exp %148 : vector<1x384xf32>
    %cst_43 = arith.constant 1.000000e+00 : f32
    %150 = vector.broadcast %cst_43 : f32 to vector<1x384xf32>
    %151 = arith.addf %150, %149 : vector<1x384xf32>
    %152 = arith.divf %150, %151 : vector<1x384xf32>
    %153 = vector.extract_strided_slice %146 {offsets = [0, 384], sizes = [1, 128], strides = [1, 1]} : vector<1x512xf32> to vector<1x128xf32>
    %154 = math.tanh %153 : vector<1x128xf32>
    %155 = vector.extract_strided_slice %152 {offsets = [0, 0], sizes = [1, 128], strides = [1, 1]} : vector<1x384xf32> to vector<1x128xf32>
    %156 = vector.extract_strided_slice %152 {offsets = [0, 128], sizes = [1, 128], strides = [1, 1]} : vector<1x384xf32> to vector<1x128xf32>
    %157 = vector.extract_strided_slice %152 {offsets = [0, 256], sizes = [1, 128], strides = [1, 1]} : vector<1x384xf32> to vector<1x128xf32>
    %158 = arith.mulf %156, %138 : vector<1x128xf32>
    %159 = arith.mulf %155, %154 : vector<1x128xf32>
    %160 = arith.addf %158, %159 : vector<1x128xf32>
    %161 = math.tanh %160 : vector<1x128xf32>
    %162 = arith.mulf %157, %161 : vector<1x128xf32>
    %c7_i32 = arith.constant 7 : i32
    %163 = arith.index_cast %c7_i32 : i32 to index
    %c0_44 = arith.constant 0 : index
    %164 = vector.load %arg7[%163, %c0_44] : memref<8x512xf32, #tpu.memory_space<vmem>>, vector<1x512xf32>
    %165 = arith.truncf %162 : vector<1x128xf32> to vector<1x128xbf16>
    %c0_45 = arith.constant 0 : index
    %c0_46 = arith.constant 0 : index
    %166 = vector.load %arg2[%c0_45, %c0_46] : memref<128x512xbf16, #tpu.memory_space<vmem>>, vector<128x512xbf16>
    %cst_47 = arith.constant dense<0.000000e+00> : vector<1x512xf32>
    %167 = tpu.matmul %165, %166, %cst_47 {dimension_numbers = #tpu.dot_dimension_numbers<[1], [0], [0], [1], [0, 0, 1, 1], [], []>} : vector<1x128xbf16>, vector<128x512xbf16>, vector<1x512xf32> -> vector<1x512xf32>
    %168 = arith.addf %164, %167 : vector<1x512xf32>
    %169 = vector.extract_strided_slice %168 {offsets = [0, 0], sizes = [1, 384], strides = [1, 1]} : vector<1x512xf32> to vector<1x384xf32>
    %170 = arith.negf %169 : vector<1x384xf32>
    %171 = math.exp %170 : vector<1x384xf32>
    %cst_48 = arith.constant 1.000000e+00 : f32
    %172 = vector.broadcast %cst_48 : f32 to vector<1x384xf32>
    %173 = arith.addf %172, %171 : vector<1x384xf32>
    %174 = arith.divf %172, %173 : vector<1x384xf32>
    %175 = vector.extract_strided_slice %168 {offsets = [0, 384], sizes = [1, 128], strides = [1, 1]} : vector<1x512xf32> to vector<1x128xf32>
    %176 = math.tanh %175 : vector<1x128xf32>
    %177 = vector.extract_strided_slice %174 {offsets = [0, 0], sizes = [1, 128], strides = [1, 1]} : vector<1x384xf32> to vector<1x128xf32>
    %178 = vector.extract_strided_slice %174 {offsets = [0, 128], sizes = [1, 128], strides = [1, 1]} : vector<1x384xf32> to vector<1x128xf32>
    %179 = vector.extract_strided_slice %174 {offsets = [0, 256], sizes = [1, 128], strides = [1, 1]} : vector<1x384xf32> to vector<1x128xf32>
    %180 = arith.mulf %178, %160 : vector<1x128xf32>
    %181 = arith.mulf %177, %176 : vector<1x128xf32>
    %182 = arith.addf %180, %181 : vector<1x128xf32>
    %183 = math.tanh %182 : vector<1x128xf32>
    %184 = arith.mulf %179, %183 : vector<1x128xf32>
    %c8_i32 = arith.constant 8 : i32
    %c0_49 = arith.constant 0 : index
    %c0_50 = arith.constant 0 : index
    %185 = vector.load %arg4[%c0_49, %c0_50] : memref<1x128xf32, #tpu.memory_space<vmem>>, vector<1x128xf32>
    %186 = arith.mulf %184, %185 : vector<1x128xf32>
    %cst_51 = arith.constant dense<0.000000e+00> : vector<1xf32>
    %187 = vector.multi_reduction <add>, %186, %cst_51 [1] : vector<1x128xf32> to vector<1xf32>
    %188 = vector.shape_cast %187 : vector<1xf32> to vector<1x1xf32>
    %c0_52 = arith.constant 0 : index
    %c0_53 = arith.constant 0 : index
    %189 = vector.load %arg5[%c0_52, %c0_53] : memref<1x1xf32, #tpu.memory_space<vmem>>, vector<1x1xf32>
    %190 = arith.addf %188, %189 : vector<1x1xf32>
    %c0_54 = arith.constant 0 : index
    %c0_55 = arith.constant 0 : index
    %191 = vector.load %arg6[%c0_54, %c0_55] : memref<1x1xf32, #tpu.memory_space<vmem>>, vector<1x1xf32>
    tpu.vector_store %arg6[%c0_54, %c0_55], %190 {strides = array<i32>} : memref<1x1xf32, #tpu.memory_space<vmem>>, vector<1x1xf32>,
    return
  }
}

</mosaic_0001>

<bundles_post_ra>
// kernel: tpu_custom_call.1
= control target key start
LH: loop header
LB: loop body
LE: loop exit
PB: predicated region body
PF: predicated region fallthrough
CT: control target
= control target key end

     0   :  { %s2254_s0 = inlined_call_operand.hbm [shape: bf16[8,8], index: 0, kind: input, shape index: {}]   ;;  %s2255_s1 = inlined_call_operand.hbm [shape: bf16[8,512], index: 1, kind: input, shape index: {}]   ;;  %s2256_s2 = inlined_call_operand.hbm [shape: bf16[128,512], index: 2, kind: input, shape index: {}]   ;;  %s2257_s3 = inlined_call_operand.vmem [shape: f32[1,512], index: 3, kind: input, shape index: {}]   ;;  %s2258_s4 = inlined_call_operand.vmem [shape: f32[1,128], index: 4, kind: input, shape index: {}]   ;;  %s2259_s5 = inlined_call_operand.<no memory space> [shape: f32[1,1], index: 5, kind: input, shape index: {}]   ;;  %s2260_s6 = inlined_call_operand.hbm [shape: f32[1,1], index: 6, kind: output, shape index: {}]  }
   0x1   :  { %v11_v0 = vstv %s2259_s5 }
   0x2   :  { %12 = vst [vmem:[#allocation3] sm:$0x1] %v11_v0 }
   0x3   :  { %13 = vsyncpa [#allocation5], 0 }
   0x4   :  { %14 = vsyncpa [#allocation8], 0 }
   0x5   :  { %15 = vsyncpa [#allocation6], 0  ;;  %s1782_s23 = smov [#allocation7]   ;;  %s1783_s25 = smov [#allocation4]  }
   0x6   :  { %s32_s24 = sshll.u32 %s1782_s23, 4  ;;  %s22_s26 = sshll.u32 %s1783_s25, 4  ;;  %s33_s24 = int_to_ptr.vmem [resolvable:$true] %s32_s24  ;;  %s23_s26 = int_to_ptr.vmem [resolvable:$true] %s22_s26 }
   0x7   :  { %s1688_s29 = scalar_lea.hbm %s2255_s1, 256 }
   0x8   :  { %p1689_p0 = scmp.ne.s32.totalorder %s2255_s1, %s1688_s29  ;;  %p1692_p1 = scmp.lt.u32.totalorder %s1688_s29, %s2255_s1 }
   0xa   :  { %p1694_p2 = pnand %p1692_p1, %p1689_p0 }
   0xc   :  { %1697 = shalt.err (!%p1694_p2)
}
   0xd   :  { %s1698_s9 = scalar_lea.vmem %s33_s24, 256  ;;  %p1703_p4 = scmp.lt.s32.totalorder %s33_s24, %s33_s24 }
   0xe   :  { %p1699_p3 = scmp.ne.s32.totalorder %s33_s24, %s1698_s9  ;;  %p1704_p5 = scmp.lt.s32.totalorder %s1698_s9, %s1698_s9 }
  0x10   :  { %p1705_p6 = por %p1704_p5, %p1703_p4 }
  0x12   :  { %p1706_p7 = pnand %p1705_p6, %p1699_p3 }
  0x14   :  { %1709 = shalt.err (!%p1706_p7)
}
  0x15   :  { %35 = dma.hbm_to_vmem [thread:$0]  %s2255_s1, 256, %s33_s24, [#allocation8]  }
  0x16   :  { %s1710_s14 = scalar_lea.hbm %s2254_s0, 64 }
  0x17   :  { %p1711_p8 = scmp.ne.s32.totalorder %s2254_s0, %s1710_s14  ;;  %p1714_p9 = scmp.lt.u32.totalorder %s1710_s14, %s2254_s0 }
  0x19   :  { %p1716_p10 = pnand %p1714_p9, %p1711_p8 }
  0x1b   :  { %1719 = shalt.err (!%p1716_p10)
}
  0x1c   :  { %s1720_s19 = scalar_lea.vmem %s23_s26, 64  ;;  %p1725_p12 = scmp.lt.s32.totalorder %s23_s26, %s23_s26 }
  0x1d   :  { %p1721_p11 = scmp.ne.s32.totalorder %s23_s26, %s1720_s19  ;;  %p1726_p13 = scmp.lt.s32.totalorder %s1720_s19, %s1720_s19 }
  0x1f   :  { %p1727_p0 = por %p1726_p13, %p1725_p12 }
  0x21   :  { %p1728_p1 = pnand %p1727_p0, %p1721_p11 }
  0x23   :  { %1731 = shalt.err (!%p1728_p1)
}
  0x24   :  { %25 = dma.hbm_to_vmem [thread:$0]  %s2254_s0, 64, %s23_s26, [#allocation5]  }
  0x25   :  { %s1784_s21 = smov [#allocation9]   ;;  %s1732_s25 = scalar_lea.hbm %s2256_s2, 4096 }
  0x26   :  { %s41_s22 = sshll.u32 %s1784_s21, 4  ;;  %p1733_p2 = scmp.ne.s32.totalorder %s2256_s2, %s1732_s25  ;;  %s42_s22 = int_to_ptr.vmem [resolvable:$true] %s41_s22 }
  0x27   :  { %p1736_p3 = scmp.lt.u32.totalorder %s1732_s25, %s2256_s2 }
  0x29   :  { %p1738_p4 = pnand %p1736_p3, %p1733_p2 }
  0x2b   :  { %1741 = shalt.err (!%p1738_p4)
}
  0x2c   :  { %s1742_s7 = scalar_lea.vmem %s42_s22, 4096  ;;  %p1747_p6 = scmp.lt.s32.totalorder %s42_s22, %s42_s22 }
  0x2d   :  { %p1743_p5 = scmp.ne.s32.totalorder %s42_s22, %s1742_s7  ;;  %p1748_p7 = scmp.lt.s32.totalorder %s1742_s7, %s1742_s7 }
  0x2f   :  { %p1749_p8 = por %p1748_p7, %p1747_p6 }
  0x31   :  { %p1750_p9 = pnand %p1749_p8, %p1743_p5 }
  0x33   :  { %1753 = shalt.err (!%p1750_p9)
}
  0x34   :  { %s1785_s0 = smov 256   ;;  %s1786_s26 = smov 16  }
  0x35   :  { %47 = dma.hbm_to_vmem [thread:$0]  %s2256_s2, 4096, %s42_s22, [#allocation8], %s1785_s0, %s1785_s0, %s1786_s26  }
  0x36   :  { %1776 = dma.done.wait [#allocation5], 64  }
  0x37   :  { %1777 = vsyncadd [#allocation5], 4294967232 }
  0x38   :  { %1778 = dma.done.wait [#allocation8], 4352  }
  0x39   :  { %1779 = vsyncadd [#allocation8], 4294962944  ;;  %v1787_v1 = vmov 0   ;;  %v65_v2 = vld [vmem:[#allocation7] sm:$0xff]  ;;  %vm103_vm0 = vcmask 1043456   ;;  %v66_v3 = vld [vmem:[#allocation7 + $0x8] sm:$0xff]  ;;  %v69_v43 = vlaneseq }
  0x3a   :  { %148 = vmatprep.mubr.bf16.mxu0 %v1787_v1  ;;  %189 = vmatprep.mubr.bf16.mxu1 %v1787_v1  ;;  %v1499_v4 = vcombine.high %v65_v2, %v65_v2  ;;  %v1501_v5 = vcombine.high %v66_v3, %v66_v3  ;;  %v1498_v6 = vcombine.low %v65_v2, %v65_v2  ;;  %v1866_v8 = vld [vmem:[#allocation9 + $0x4] ss:$16 sps:$4 sm:$0xff]   ;;  %v64_v9 = vld [vmem:[#allocation4] sm:$0xf]  ;;  %v1870_v13 = vld [vmem:[#allocation9] ss:$16 sps:$4 sm:$0xff]  }
  0x3b   :  { %v1500_v7 = vcombine.low %v66_v3, %v66_v3  ;;  %v1868_v10 = vld [vmem:[#allocation9 + $0xc] ss:$16 sps:$4 sm:$0xff]   ;;  %v1872_v14 = vld [vmem:[#allocation9 + $0x8] ss:$16 sps:$4 sm:$0xff]   ;;  %vm99_vm1 = vcmask 64512   ;;  %v70_v44 = vshrl.u32 %v69_v43, 7 }
  0x3c   :  { %1502 = vmatprep.subr.msk.bf16.mxu0 %vm103_vm0, %v1499_v4  ;;  %1504 = vmatprep.subr.msk.bf16.mxu1 %vm103_vm0, %v1501_v5  ;;  %v105_v11 = vsel %vm103_vm0, %v1498_v6, 0  ;;  %v1874_v15 = vld [vmem:[#allocation9 + $0x24] ss:$16 sps:$4 sm:$0xff]   ;;  %v1878_v16 = vld [vmem:[#allocation9 + $0x2c] ss:$16 sps:$4 sm:$0xff]   ;;  %vm1474_vm2 = vcmask 1040384  }
  0x3d   :  { %v111_v12 = vsel %vm103_vm0, %v1500_v7, 0  ;;  %117 = vmatpush1.bf16.msra.mxu0 %v105_v11  ;;  %v1880_v17 = vld [vmem:[#allocation9 + $0x20] ss:$16 sps:$4 sm:$0xff]   ;;  %v1884_v18 = vld [vmem:[#allocation9 + $0x28] ss:$16 sps:$4 sm:$0xff]   ;;  %v71_v45 = vsub.s32 0, %v70_v44 }
  0x3e   :  { %158 = vmatpush1.bf16.msra.mxu1 %v111_v12  ;;  %395 = vmatprep.subr.bf16.mxu0 %v1866_v8  ;;  %v1886_v19 = vld [vmem:[#allocation9 + $0x44] ss:$16 sps:$4 sm:$0xff]   ;;  %v1890_v20 = vld [vmem:[#allocation9 + $0x4c] ss:$16 sps:$4 sm:$0xff]   ;;  %v1894_v21 = vld [vmem:[#allocation9 + $0x40] ss:$16 sps:$4 sm:$0xff]  }
  0x3f   :  { %436 = vmatprep.subr.bf16.mxu1 %v1868_v10  ;;  %v1896_v22 = vld [vmem:[#allocation9 + $0x48] ss:$16 sps:$4 sm:$0xff]   ;;  %v1900_v23 = vld [vmem:[#allocation9 + $0x64] ss:$16 sps:$4 sm:$0xff]   ;;  %v1904_v24 = vld [vmem:[#allocation9 + $0x6c] ss:$16 sps:$4 sm:$0xff]  }
  0x40   :  { %1503 = vmatmul.mubr.msk.bf16.vlgmr.msra.gmra.mrb[0].mxu0 %vm99_vm1, %v64_v9  ;;  %v1906_v25 = vld [vmem:[#allocation9 + $0x60] ss:$16 sps:$4 sm:$0xff]   ;;  %v1910_v26 = vld [vmem:[#allocation9 + $0x68] ss:$16 sps:$4 sm:$0xff]   ;;  %v1912_v27 = vld [vmem:[#allocation9 + $0x84] ss:$16 sps:$4 sm:$0xff]  }
  0x41   :  { %1505 = vmatmul.mubr.msk.bf16.vlgmr.msra.gmra.mrb[0].mxu1 %vm99_vm1, %v64_v9  ;;  %396 = vmatpush1.bf16.msra.mxu0 %v1870_v13  ;;  %v1916_v28 = vld [vmem:[#allocation9 + $0x8c] ss:$16 sps:$4 sm:$0xff]   ;;  %v1918_v29 = vld [vmem:[#allocation9 + $0x80] ss:$16 sps:$4 sm:$0xff]   ;;  %v1920_v30 = vld [vmem:[#allocation9 + $0x88] ss:$16 sps:$4 sm:$0xff]  }
  0x42   :  { %437 = vmatpush1.bf16.msra.mxu1 %v1872_v14  ;;  %397 = vmatprep.subr.bf16.mxu0 %v1874_v15  ;;  %v1924_v31 = vld [vmem:[#allocation9 + $0xa4] ss:$16 sps:$4 sm:$0xff]   ;;  %v1928_v32 = vld [vmem:[#allocation9 + $0xac] ss:$16 sps:$4 sm:$0xff]   ;;  %v1932_v33 = vld [vmem:[#allocation9 + $0xa0] ss:$16 sps:$4 sm:$0xff]  }
  0x43   :  { %438 = vmatprep.subr.bf16.mxu1 %v1878_v16  ;;  %427 = vmatprep.mubr.bf16.mxu0 %v1787_v1  ;;  %v1934_v34 = vld [vmem:[#allocation9 + $0xa8] ss:$16 sps:$4 sm:$0xff]   ;;  %v1938_v35 = vld [vmem:[#allocation9 + $0xc4] ss:$16 sps:$4 sm:$0xff]   ;;  %v1940_v36 = vld [vmem:[#allocation9 + $0xcc] ss:$16 sps:$4 sm:$0xff]  }
  0x44   :  { %468 = vmatprep.mubr.bf16.mxu1 %v1787_v1  ;;  %v1944_v37 = vld [vmem:[#allocation9 + $0xc0] ss:$16 sps:$4 sm:$0xff]   ;;  %v1946_v38 = vld [vmem:[#allocation9 + $0xc8] ss:$16 sps:$4 sm:$0xff]   ;;  %v1950_v39 = vld [vmem:[#allocation9 + $0xe4] ss:$16 sps:$4 sm:$0xff]  }
  0x45   :  { %398 = vmatpush1.bf16.msra.mxu0 %v1880_v17  ;;  %v1952_v40 = vld [vmem:[#allocation9 + $0xec] ss:$16 sps:$4 sm:$0xff]   ;;  %v1956_v41 = vld [vmem:[#allocation9 + $0xe0] ss:$16 sps:$4 sm:$0xff]   ;;  %v1958_v42 = vld [vmem:[#allocation9 + $0xe8] ss:$16 sps:$4 sm:$0xff]  }
  0x46   :  { %439 = vmatpush1.bf16.msra.mxu1 %v1884_v18  ;;  %399 = vmatprep.subr.bf16.mxu0 %v1886_v19  ;;  %v79_v46 = vsub.s32 2, %v70_v44  ;;  %v67_v47 = vld [vmem:[%s2257_s3] sm:$0xf]  ;;  %v75_v48 = vsub.s32 1, %v70_v44  ;;  %v83_v49 = vsub.s32 3, %v70_v44  ;;  %s1789_s11 = smov [#allocation10]  }
  0x47   :  { %440 = vmatprep.subr.bf16.mxu1 %v1890_v20  ;;  %v72_v50 = vrot.slane %v67_v47, %v71_v45  ;;  %v1788_v3 = vmov 1966171168   ;;  %s1488_s12 = sshll.u32 %s1789_s11, 4  ;;  %vm1480_vm3 = vcmask 0   ;;  %s1489_s12 = int_to_ptr.vmem [resolvable:$true] %s1488_s12 }
  0x48   :  { %v80_v51 = vrot.slane %v67_v47, %v79_v46  ;;  %v76_v52 = vrot.slane %v67_v47, %v75_v48  ;;  %v84_v53 = vrot.slane %v67_v47, %v83_v49  ;;  %v484_v4 = vunpack.c.l.s4 %v1788_v3  ;;  %s1754_s13 = scalar_lea.vmem %s1489_s12, 16  ;;  %s1758_s14 = scalar_lea.vmem %s1489_s12, 32 }
  0x49   :  { %400 = vmatpush1.bf16.msra.mxu0 %v1894_v21  ;;  %p1755_p10 = scmp.ne.s32.totalorder %s1489_s12, %s1754_s13  ;;  %p1759_p11 = scmp.lt.s32.totalorder %s1489_s12, %s1489_s12 }
  0x4a   :  { %441 = vmatpush1.bf16.msra.mxu1 %v1896_v22  ;;  %401 = vmatprep.subr.bf16.mxu0 %v1900_v23  ;;  %v485_v5 = vunpack.c.0.s8 %v484_v4  ;;  %p1760_p12 = scmp.lt.s32.totalorder %s1758_s14, %s1754_s13 }
  0x4b   :  { %442 = vmatprep.subr.bf16.mxu1 %v1904_v24 }
  0x4c   :  { %v2005_v6 = vsub.s32 %v485_v5, %v70_v44  ;;  %p1761_p13 = por %p1760_p12, %p1759_p11 }
  0x4d   :  { %402 = vmatpush1.bf16.msra.mxu0 %v1906_v25 }
  0x4e   :  { %443 = vmatpush1.bf16.msra.mxu1 %v1910_v26  ;;  %403 = vmatprep.subr.bf16.mxu0 %v1912_v27  ;;  %p1762_p0 = pnand %p1761_p13, %p1755_p10 }
  0x4f   :  { %444 = vmatprep.subr.bf16.mxu1 %v1916_v28 }
  0x51   :  { %404 = vmatpush1.bf16.msra.mxu0 %v1918_v29 }
  0x52   :  { %445 = vmatpush1.bf16.msra.mxu1 %v1920_v30  ;;  %405 = vmatprep.subr.bf16.mxu0 %v1924_v31 }
  0x53   :  { %446 = vmatprep.subr.bf16.mxu1 %v1928_v32 }
  0x55   :  { %406 = vmatpush1.bf16.msra.mxu0 %v1932_v33 }
  0x56   :  { %447 = vmatpush1.bf16.msra.mxu1 %v1934_v34  ;;  %407 = vmatprep.subr.bf16.mxu0 %v1938_v35 }
  0x57   :  { %448 = vmatprep.subr.bf16.mxu1 %v1940_v36 }
  0x59   :  { %408 = vmatpush1.bf16.msra.mxu0 %v1944_v37 }
  0x5a   :  { %449 = vmatpush1.bf16.msra.mxu1 %v1946_v38  ;;  %409 = vmatprep.subr.bf16.mxu0 %v1950_v39 }
  0x5b   :  { %450 = vmatprep.subr.bf16.mxu1 %v1952_v40 }
  0x5d   :  { %410 = vmatpush1.bf16.msra.mxu0 %v1956_v41 }
  0x5e   :  { %451 = vmatpush1.bf16.msra.mxu1 %v1958_v42  ;;  %530 = vmatprep.subr.bf16.mxu0 %v1866_v8 }
  0x5f   :  { %571 = vmatprep.subr.bf16.mxu1 %v1868_v10 }
  0x60   :  { %428 = vmatmul.mubr.bf16.vlgmr.msra.gmra.mrb[4].mxu0 %v1787_v1 }
  0x61   :  { %469 = vmatmul.mubr.bf16.vlgmr.msra.gmra.mrb[4].mxu1 %v1787_v1  ;;  %531 = vmatpush1.bf16.msra.mxu0 %v1870_v13 }
  0x62   :  { %572 = vmatpush1.bf16.msra.mxu1 %v1872_v14  ;;  %532 = vmatprep.subr.bf16.mxu0 %v1874_v15 }
  0x63   :  { %573 = vmatprep.subr.bf16.mxu1 %v1878_v16  ;;  %562 = vmatprep.mubr.bf16.mxu0 %v1787_v1 }
  0x64   :  { %603 = vmatprep.mubr.bf16.mxu1 %v1787_v1 }
  0x65   :  { %533 = vmatpush1.bf16.msra.mxu0 %v1880_v17 }
  0x66   :  { %574 = vmatpush1.bf16.msra.mxu1 %v1884_v18  ;;  %534 = vmatprep.subr.bf16.mxu0 %v1886_v19 }
  0x67   :  { %575 = vmatprep.subr.bf16.mxu1 %v1890_v20 }
  0x69   :  { %535 = vmatpush1.bf16.msra.mxu0 %v1894_v21 }
  0x6a   :  { %576 = vmatpush1.bf16.msra.mxu1 %v1896_v22  ;;  %536 = vmatprep.subr.bf16.mxu0 %v1900_v23 }
  0x6b   :  { %577 = vmatprep.subr.bf16.mxu1 %v1904_v24 }
  0x6d   :  { %537 = vmatpush1.bf16.msra.mxu0 %v1906_v25 }
  0x6e   :  { %578 = vmatpush1.bf16.msra.mxu1 %v1910_v26  ;;  %538 = vmatprep.subr.bf16.mxu0 %v1912_v27 }
  0x6f   :  { %579 = vmatprep.subr.bf16.mxu1 %v1916_v28 }
  0x71   :  { %539 = vmatpush1.bf16.msra.mxu0 %v1918_v29 }
  0x72   :  { %580 = vmatpush1.bf16.msra.mxu1 %v1920_v30  ;;  %540 = vmatprep.subr.bf16.mxu0 %v1924_v31 }
  0x73   :  { %581 = vmatprep.subr.bf16.mxu1 %v1928_v32 }
  0x75   :  { %541 = vmatpush1.bf16.msra.mxu0 %v1932_v33 }
  0x76   :  { %582 = vmatpush1.bf16.msra.mxu1 %v1934_v34  ;;  %542 = vmatprep.subr.bf16.mxu0 %v1938_v35 }
  0x77   :  { %583 = vmatprep.subr.bf16.mxu1 %v1940_v36 }
  0x79   :  { %543 = vmatpush1.bf16.msra.mxu0 %v1944_v37 }
  0x7a   :  { %584 = vmatpush1.bf16.msra.mxu1 %v1946_v38  ;;  %544 = vmatprep.subr.bf16.mxu0 %v1950_v39 }
  0x7b   :  { %585 = vmatprep.subr.bf16.mxu1 %v1952_v40 }
  0x7d   :  { %545 = vmatpush1.bf16.msra.mxu0 %v1956_v41 }
  0x7e   :  { %586 = vmatpush1.bf16.msra.mxu1 %v1958_v42  ;;  %665 = vmatprep.subr.bf16.mxu0 %v1866_v8 }
  0x7f   :  { %706 = vmatprep.subr.bf16.mxu1 %v1868_v10 }
 0x113   :  { %v150_v54 = vpop.f32.mrb[0].mxu0 }
 0x114   :  { %v191_v55 = vpop.f32.mrb[0].mxu1  ;;  %v151_v56 = vadd.f32 %v150_v54, %v72_v50  ;;  %v152_v58 = vpop.f32.mrb[1].mxu0 }
 0x115   :  { %v192_v57 = vadd.f32 %v191_v55, %v80_v51  ;;  %v193_v59 = vpop.f32.mrb[1].mxu1  ;;  %v153_v60 = vadd.f32 %v152_v58, %v76_v52  ;;  %v154_v62 = vpop.f32.mrb[2].mxu0 }
 0x116   :  { %v194_v61 = vadd.f32 %v193_v59, %v84_v53  ;;  %v195_v63 = vpop.f32.mrb[2].mxu1  ;;  %198 = vst [vmem:[#allocation2] sm:$0xff] %v151_v56  ;;  %v155_v0 = vpop.f32.mrb[3].mxu0 }
 0x117   :  { %200 = vst [vmem:[#allocation2 + $0x10] sm:$0xff] %v192_v57  ;;  %v196_v2 = vpop.f32.mrb[3].mxu1  ;;  %199 = vst [vmem:[#allocation2 + $0x8] sm:$0xff] %v153_v60 }
 0x118   :  { %201 = vst [vmem:[#allocation2 + $0x18] sm:$0xff] %v194_v61 }
 0x11f   :  { %v202_v54 = vld [vmem:[#allocation2] ss:$8 sm:$0xf] }
 0x133   :  { %v429_v7 = vpop.f32.mrb[4].mxu0 }
 0x134   :  { %v470_v9 = vpop.f32.mrb[4].mxu1  ;;  %v431_v11 = vpop.f32.mrb[5].mxu0 }
 0x135   :  { %v472_v12 = vpop.f32.mrb[5].mxu1  ;;  %v481_v43 = vcombine.low %v429_v7, %v431_v11  ;;  %v433_v46 = vpop.f32.mrb[6].mxu0 }
 0x136   :  { %v482_v45 = vcombine.low %v470_v9, %v472_v12  ;;  %v474_v47 = vpop.f32.mrb[6].mxu1  ;;  %v434_v48 = vpop.f32.mrb[7].mxu0 }
 0x137   :  { %v475_v49 = vpop.f32.mrb[7].mxu1  ;;  %v489_v50 = vrot.slane %v481_v43, %v2005_v6 }
 0x138   :  { %v496_v51 = vrot.slane %v482_v45, %v2005_v6 }
 0x13a   :  { %v497_v52 = vcombine.low %v489_v50, %v496_v51 }
 0x13c   :  { %v504_v53 = vrot.slane %v497_v52, %v2005_v6 }
 0x13e   :  { %v506_v44 = vadd.f32 %v504_v53, %v202_v54  ;;  %v528_v54 = vld [vmem:[#allocation2 + $0x1] ss:$8 sm:$0xf] }
 0x140   :  { %v1538_v55 = vmul.f32 -1.442695, %v506_v44  ;;  %v514_v58 = vrot.slane %v506_v44, 3 }
 0x142   :  { %1606 = vpow2.f32 %v1538_v55 }
 0x14c   :  { %v1607_v56 = vpop.eup %1606 }
 0x14d   :  { %v510_v57 = vadd.f32 1.0, %v1607_v56 }
 0x14f   :  { %1608 = vrcp.f32 %v510_v57 }
 0x150   :  { %1610 = vtanh.f32 %v514_v58 }
 0x159   :  { %v1609_v59 = vpop.eup %1608 }
 0x15a   :  { %v518_v60 = vrot.slane %v1609_v59, 1  ;;  %v1611_v61 = vpop.eup %1610  ;;  %v524_v2 = vrot.slane %v1609_v59, 2 }
 0x15b   :  { %v521_v62 = vmul.f32 %v1611_v61, %v1609_v59 }
 0x15c   :  { %v520_v63 = vmul.f32 0.0, %v518_v60 }
 0x15e   :  { %v2010_v0 = vadd.f32 %v521_v62, %v520_v63 }
 0x160   :  { %1612 = vtanh.f32 %v2010_v0 }
 0x16a   :  { %v1613_v3 = vpop.eup %1612 }
 0x16b   :  { %v526_v4 = vmul.f32 %v1613_v3, %v524_v2 }
 0x16d   :  { %v529_v5 = vpack.c.bf16 %v526_v4, %v526_v4 }
 0x16f   :  { %563 = vmatmul.mubr.bf16.vlgmr.msra.gmra.mrb[8].mxu0 %v529_v5  ;;  %604 = vmatmul.mubr.bf16.vlgmr.msra.gmra.mrb[8].mxu1 %v529_v5 }
 0x170   :  { %666 = vmatpush1.bf16.msra.mxu0 %v1870_v13  ;;  %707 = vmatpush1.bf16.msra.mxu1 %v1872_v14 }
 0x171   :  { %667 = vmatprep.subr.bf16.mxu0 %v1874_v15  ;;  %708 = vmatprep.subr.bf16.mxu1 %v1878_v16 }
 0x172   :  { %697 = vmatprep.mubr.bf16.mxu0 %v1787_v1  ;;  %738 = vmatprep.mubr.bf16.mxu1 %v1787_v1 }
 0x174   :  { %668 = vmatpush1.bf16.msra.mxu0 %v1880_v17  ;;  %709 = vmatpush1.bf16.msra.mxu1 %v1884_v18 }
 0x175   :  { %669 = vmatprep.subr.bf16.mxu0 %v1886_v19  ;;  %710 = vmatprep.subr.bf16.mxu1 %v1890_v20 }
 0x178   :  { %670 = vmatpush1.bf16.msra.mxu0 %v1894_v21  ;;  %711 = vmatpush1.bf16.msra.mxu1 %v1896_v22 }
 0x179   :  { %671 = vmatprep.subr.bf16.mxu0 %v1900_v23  ;;  %712 = vmatprep.subr.bf16.mxu1 %v1904_v24 }
 0x17c   :  { %672 = vmatpush1.bf16.msra.mxu0 %v1906_v25  ;;  %713 = vmatpush1.bf16.msra.mxu1 %v1910_v26 }
 0x17d   :  { %673 = vmatprep.subr.bf16.mxu0 %v1912_v27  ;;  %714 = vmatprep.subr.bf16.mxu1 %v1916_v28 }
 0x180   :  { %674 = vmatpush1.bf16.msra.mxu0 %v1918_v29  ;;  %715 = vmatpush1.bf16.msra.mxu1 %v1920_v30 }
 0x181   :  { %675 = vmatprep.subr.bf16.mxu0 %v1924_v31  ;;  %716 = vmatprep.subr.bf16.mxu1 %v1928_v32 }
 0x184   :  { %676 = vmatpush1.bf16.msra.mxu0 %v1932_v33  ;;  %717 = vmatpush1.bf16.msra.mxu1 %v1934_v34 }
 0x185   :  { %677 = vmatprep.subr.bf16.mxu0 %v1938_v35  ;;  %718 = vmatprep.subr.bf16.mxu1 %v1940_v36 }
 0x188   :  { %678 = vmatpush1.bf16.msra.mxu0 %v1944_v37  ;;  %719 = vmatpush1.bf16.msra.mxu1 %v1946_v38 }
 0x189   :  { %679 = vmatprep.subr.bf16.mxu0 %v1950_v39  ;;  %720 = vmatprep.subr.bf16.mxu1 %v1952_v40 }
 0x18c   :  { %680 = vmatpush1.bf16.msra.mxu0 %v1956_v41  ;;  %721 = vmatpush1.bf16.msra.mxu1 %v1958_v42 }
 0x18d   :  { %800 = vmatprep.subr.bf16.mxu0 %v1866_v8  ;;  %841 = vmatprep.subr.bf16.mxu1 %v1868_v10 }
 0x242   :  { %v564_v7 = vpop.f32.mrb[8].mxu0  ;;  %v605_v9 = vpop.f32.mrb[8].mxu1 }
 0x243   :  { %v566_v11 = vpop.f32.mrb[9].mxu0  ;;  %v607_v12 = vpop.f32.mrb[9].mxu1 }
 0x244   :  { %v616_v43 = vcombine.low %v564_v7, %v566_v11  ;;  %v617_v45 = vcombine.low %v605_v9, %v607_v12  ;;  %v568_v46 = vpop.f32.mrb[10].mxu0  ;;  %v609_v47 = vpop.f32.mrb[10].mxu1 }
 0x245   :  { %v569_v48 = vpop.f32.mrb[11].mxu0  ;;  %v610_v49 = vpop.f32.mrb[11].mxu1 }
 0x246   :  { %v624_v50 = vrot.slane %v616_v43, %v2005_v6  ;;  %v631_v51 = vrot.slane %v617_v45, %v2005_v6 }
 0x248   :  { %v632_v52 = vcombine.low %v624_v50, %v631_v51 }
 0x24a   :  { %v639_v53 = vrot.slane %v632_v52, %v2005_v6 }
 0x24c   :  { %v641_v44 = vadd.f32 %v639_v53, %v528_v54  ;;  %v663_v54 = vld [vmem:[#allocation2 + $0x2] ss:$8 sm:$0xf] }
 0x24e   :  { %v1539_v55 = vmul.f32 -1.442695, %v641_v44  ;;  %v649_v58 = vrot.slane %v641_v44, 3 }
 0x250   :  { %1614 = vpow2.f32 %v1539_v55 }
 0x25a   :  { %v1615_v56 = vpop.eup %1614 }
 0x25b   :  { %v645_v57 = vadd.f32 1.0, %v1615_v56 }
 0x25d   :  { %1616 = vrcp.f32 %v645_v57 }
 0x25e   :  { %1618 = vtanh.f32 %v649_v58 }
 0x267   :  { %v1617_v59 = vpop.eup %1616 }
 0x268   :  { %v653_v60 = vrot.slane %v1617_v59, 1  ;;  %v1619_v61 = vpop.eup %1618  ;;  %v659_v3 = vrot.slane %v1617_v59, 2 }
 0x269   :  { %v656_v62 = vmul.f32 %v1619_v61, %v1617_v59 }
 0x26a   :  { %v655_v63 = vmul.f32 %v653_v60, %v2010_v0 }
 0x26c   :  { %v2051_v2 = vadd.f32 %v656_v62, %v655_v63 }
 0x26e   :  { %1620 = vtanh.f32 %v2051_v2 }
 0x278   :  { %v1621_v4 = vpop.eup %1620 }
 0x279   :  { %v661_v5 = vmul.f32 %v1621_v4, %v659_v3 }
 0x27b   :  { %v664_v7 = vpack.c.bf16 %v661_v5, %v661_v5 }
 0x27d   :  { %698 = vmatmul.mubr.bf16.vlgmr.msra.gmra.mrb[12].mxu0 %v664_v7  ;;  %739 = vmatmul.mubr.bf16.vlgmr.msra.gmra.mrb[12].mxu1 %v664_v7 }
 0x27e   :  { %801 = vmatpush1.bf16.msra.mxu0 %v1870_v13  ;;  %842 = vmatpush1.bf16.msra.mxu1 %v1872_v14 }
 0x27f   :  { %802 = vmatprep.subr.bf16.mxu0 %v1874_v15  ;;  %843 = vmatprep.subr.bf16.mxu1 %v1878_v16 }
 0x280   :  { %832 = vmatprep.mubr.bf16.mxu0 %v1787_v1  ;;  %873 = vmatprep.mubr.bf16.mxu1 %v1787_v1 }
 0x282   :  { %803 = vmatpush1.bf16.msra.mxu0 %v1880_v17  ;;  %844 = vmatpush1.bf16.msra.mxu1 %v1884_v18 }
 0x283   :  { %804 = vmatprep.subr.bf16.mxu0 %v1886_v19  ;;  %845 = vmatprep.subr.bf16.mxu1 %v1890_v20 }
 0x286   :  { %805 = vmatpush1.bf16.msra.mxu0 %v1894_v21  ;;  %846 = vmatpush1.bf16.msra.mxu1 %v1896_v22 }
 0x287   :  { %806 = vmatprep.subr.bf16.mxu0 %v1900_v23  ;;  %847 = vmatprep.subr.bf16.mxu1 %v1904_v24 }
 0x28a   :  { %807 = vmatpush1.bf16.msra.mxu0 %v1906_v25  ;;  %848 = vmatpush1.bf16.msra.mxu1 %v1910_v26 }
 0x28b   :  { %808 = vmatprep.subr.bf16.mxu0 %v1912_v27  ;;  %849 = vmatprep.subr.bf16.mxu1 %v1916_v28 }
 0x28e   :  { %809 = vmatpush1.bf16.msra.mxu0 %v1918_v29  ;;  %850 = vmatpush1.bf16.msra.mxu1 %v1920_v30 }
 0x28f   :  { %810 = vmatprep.subr.bf16.mxu0 %v1924_v31  ;;  %851 = vmatprep.subr.bf16.mxu1 %v1928_v32 }
 0x292   :  { %811 = vmatpush1.bf16.msra.mxu0 %v1932_v33  ;;  %852 = vmatpush1.bf16.msra.mxu1 %v1934_v34 }
 0x293   :  { %812 = vmatprep.subr.bf16.mxu0 %v1938_v35  ;;  %853 = vmatprep.subr.bf16.mxu1 %v1940_v36 }
 0x296   :  { %813 = vmatpush1.bf16.msra.mxu0 %v1944_v37  ;;  %854 = vmatpush1.bf16.msra.mxu1 %v1946_v38 }
 0x297   :  { %814 = vmatprep.subr.bf16.mxu0 %v1950_v39  ;;  %855 = vmatprep.subr.bf16.mxu1 %v1952_v40 }
 0x29a   :  { %815 = vmatpush1.bf16.msra.mxu0 %v1956_v41  ;;  %856 = vmatpush1.bf16.msra.mxu1 %v1958_v42 }
 0x29b   :  { %935 = vmatprep.subr.bf16.mxu0 %v1866_v8  ;;  %976 = vmatprep.subr.bf16.mxu1 %v1868_v10 }
 0x350   :  { %v699_v0 = vpop.f32.mrb[12].mxu0  ;;  %v740_v9 = vpop.f32.mrb[12].mxu1 }
 0x351   :  { %v701_v11 = vpop.f32.mrb[13].mxu0  ;;  %v742_v12 = vpop.f32.mrb[13].mxu1 }
 0x352   :  { %v751_v43 = vcombine.low %v699_v0, %v701_v11  ;;  %v752_v45 = vcombine.low %v740_v9, %v742_v12  ;;  %v703_v46 = vpop.f32.mrb[14].mxu0  ;;  %v744_v47 = vpop.f32.mrb[14].mxu1 }
 0x353   :  { %v704_v48 = vpop.f32.mrb[15].mxu0  ;;  %v745_v49 = vpop.f32.mrb[15].mxu1 }
 0x354   :  { %v759_v50 = vrot.slane %v751_v43, %v2005_v6  ;;  %v766_v51 = vrot.slane %v752_v45, %v2005_v6 }
 0x356   :  { %v767_v52 = vcombine.low %v759_v50, %v766_v51 }
 0x358   :  { %v774_v53 = vrot.slane %v767_v52, %v2005_v6 }
 0x35a   :  { %v776_v44 = vadd.f32 %v774_v53, %v663_v54  ;;  %v798_v54 = vld [vmem:[#allocation2 + $0x3] ss:$8 sm:$0xf] }
 0x35c   :  { %v1540_v55 = vmul.f32 -1.442695, %v776_v44  ;;  %v784_v58 = vrot.slane %v776_v44, 3 }
 0x35e   :  { %1622 = vpow2.f32 %v1540_v55 }
 0x368   :  { %v1623_v56 = vpop.eup %1622 }
 0x369   :  { %v780_v57 = vadd.f32 1.0, %v1623_v56 }
 0x36b   :  { %1624 = vrcp.f32 %v780_v57 }
 0x36c   :  { %1626 = vtanh.f32 %v784_v58 }
 0x375   :  { %v1625_v59 = vpop.eup %1624 }
 0x376   :  { %v788_v60 = vrot.slane %v1625_v59, 1  ;;  %v1627_v61 = vpop.eup %1626  ;;  %v794_v4 = vrot.slane %v1625_v59, 2 }
 0x377   :  { %v791_v62 = vmul.f32 %v1627_v61, %v1625_v59 }
 0x378   :  { %v790_v63 = vmul.f32 %v788_v60, %v2051_v2 }
 0x37a   :  { %v2092_v3 = vadd.f32 %v791_v62, %v790_v63 }
 0x37c   :  { %1628 = vtanh.f32 %v2092_v3 }
 0x386   :  { %v1629_v5 = vpop.eup %1628 }
 0x387   :  { %v796_v7 = vmul.f32 %v1629_v5, %v794_v4 }
 0x389   :  { %v799_v0 = vpack.c.bf16 %v796_v7, %v796_v7 }
 0x38b   :  { %833 = vmatmul.mubr.bf16.vlgmr.msra.gmra.mrb[16].mxu0 %v799_v0  ;;  %874 = vmatmul.mubr.bf16.vlgmr.msra.gmra.mrb[16].mxu1 %v799_v0 }
 0x38c   :  { %936 = vmatpush1.bf16.msra.mxu0 %v1870_v13  ;;  %977 = vmatpush1.bf16.msra.mxu1 %v1872_v14 }
 0x38d   :  { %937 = vmatprep.subr.bf16.mxu0 %v1874_v15  ;;  %978 = vmatprep.subr.bf16.mxu1 %v1878_v16 }
 0x38e   :  { %967 = vmatprep.mubr.bf16.mxu0 %v1787_v1  ;;  %1008 = vmatprep.mubr.bf16.mxu1 %v1787_v1 }
 0x390   :  { %938 = vmatpush1.bf16.msra.mxu0 %v1880_v17  ;;  %979 = vmatpush1.bf16.msra.mxu1 %v1884_v18 }
 0x391   :  { %939 = vmatprep.subr.bf16.mxu0 %v1886_v19  ;;  %980 = vmatprep.subr.bf16.mxu1 %v1890_v20 }
 0x394   :  { %940 = vmatpush1.bf16.msra.mxu0 %v1894_v21  ;;  %981 = vmatpush1.bf16.msra.mxu1 %v1896_v22 }
 0x395   :  { %941 = vmatprep.subr.bf16.mxu0 %v1900_v23  ;;  %982 = vmatprep.subr.bf16.mxu1 %v1904_v24 }
 0x398   :  { %942 = vmatpush1.bf16.msra.mxu0 %v1906_v25  ;;  %983 = vmatpush1.bf16.msra.mxu1 %v1910_v26 }
 0x399   :  { %943 = vmatprep.subr.bf16.mxu0 %v1912_v27  ;;  %984 = vmatprep.subr.bf16.mxu1 %v1916_v28 }
 0x39c   :  { %944 = vmatpush1.bf16.msra.mxu0 %v1918_v29  ;;  %985 = vmatpush1.bf16.msra.mxu1 %v1920_v30 }
 0x39d   :  { %945 = vmatprep.subr.bf16.mxu0 %v1924_v31  ;;  %986 = vmatprep.subr.bf16.mxu1 %v1928_v32 }
 0x3a0   :  { %946 = vmatpush1.bf16.msra.mxu0 %v1932_v33  ;;  %987 = vmatpush1.bf16.msra.mxu1 %v1934_v34 }
 0x3a1   :  { %947 = vmatprep.subr.bf16.mxu0 %v1938_v35  ;;  %988 = vmatprep.subr.bf16.mxu1 %v1940_v36 }
 0x3a4   :  { %948 = vmatpush1.bf16.msra.mxu0 %v1944_v37  ;;  %989 = vmatpush1.bf16.msra.mxu1 %v1946_v38 }
 0x3a5   :  { %949 = vmatprep.subr.bf16.mxu0 %v1950_v39  ;;  %990 = vmatprep.subr.bf16.mxu1 %v1952_v40 }
 0x3a8   :  { %950 = vmatpush1.bf16.msra.mxu0 %v1956_v41  ;;  %991 = vmatpush1.bf16.msra.mxu1 %v1958_v42 }
 0x3a9   :  { %1070 = vmatprep.subr.bf16.mxu0 %v1866_v8  ;;  %1111 = vmatprep.subr.bf16.mxu1 %v1868_v10 }
 0x45e   :  { %v834_v2 = vpop.f32.mrb[16].mxu0  ;;  %v875_v9 = vpop.f32.mrb[16].mxu1 }
 0x45f   :  { %v836_v11 = vpop.f32.mrb[17].mxu0  ;;  %v877_v12 = vpop.f32.mrb[17].mxu1 }
 0x460   :  { %v886_v43 = vcombine.low %v834_v2, %v836_v11  ;;  %v887_v45 = vcombine.low %v875_v9, %v877_v12  ;;  %v838_v46 = vpop.f32.mrb[18].mxu0  ;;  %v879_v47 = vpop.f32.mrb[18].mxu1 }
 0x461   :  { %v839_v48 = vpop.f32.mrb[19].mxu0  ;;  %v880_v49 = vpop.f32.mrb[19].mxu1 }
 0x462   :  { %v894_v50 = vrot.slane %v886_v43, %v2005_v6  ;;  %v901_v51 = vrot.slane %v887_v45, %v2005_v6 }
 0x464   :  { %v902_v52 = vcombine.low %v894_v50, %v901_v51 }
 0x466   :  { %v909_v53 = vrot.slane %v902_v52, %v2005_v6 }
 0x468   :  { %v911_v44 = vadd.f32 %v909_v53, %v798_v54 }
 0x46a   :  { %v1541_v55 = vmul.f32 -1.442695, %v911_v44  ;;  %v919_v58 = vrot.slane %v911_v44, 3 }
 0x46c   :  { %1630 = vpow2.f32 %v1541_v55 }
 0x476   :  { %v1631_v56 = vpop.eup %1630 }
 0x477   :  { %v915_v57 = vadd.f32 1.0, %v1631_v56 }
 0x479   :  { %1632 = vrcp.f32 %v915_v57 }
 0x47a   :  { %1634 = vtanh.f32 %v919_v58 }
 0x483   :  { %v1633_v59 = vpop.eup %1632 }
 0x484   :  { %v923_v60 = vrot.slane %v1633_v59, 1  ;;  %v1635_v61 = vpop.eup %1634  ;;  %v929_v5 = vrot.slane %v1633_v59, 2 }
 0x485   :  { %v926_v62 = vmul.f32 %v1635_v61, %v1633_v59 }
 0x486   :  { %v925_v63 = vmul.f32 %v923_v60, %v2092_v3 }
 0x488   :  { %v2133_v4 = vadd.f32 %v926_v62, %v925_v63 }
 0x48a   :  { %1636 = vtanh.f32 %v2133_v4 }
 0x494   :  { %v1637_v7 = vpop.eup %1636 }
 0x495   :  { %v931_v0 = vmul.f32 %v1637_v7, %v929_v5 }
 0x497   :  { %v934_v2 = vpack.c.bf16 %v931_v0, %v931_v0 }
 0x499   :  { %968 = vmatmul.mubr.bf16.vlgmr.msra.gmra.mrb[20].mxu0 %v934_v2  ;;  %1009 = vmatmul.mubr.bf16.vlgmr.msra.gmra.mrb[20].mxu1 %v934_v2 }
 0x49a   :  { %1071 = vmatpush1.bf16.msra.mxu0 %v1870_v13  ;;  %1112 = vmatpush1.bf16.msra.mxu1 %v1872_v14 }
 0x49b   :  { %1072 = vmatprep.subr.bf16.mxu0 %v1874_v15  ;;  %1113 = vmatprep.subr.bf16.mxu1 %v1878_v16 }
 0x49c   :  { %1102 = vmatprep.mubr.bf16.mxu0 %v1787_v1  ;;  %1143 = vmatprep.mubr.bf16.mxu1 %v1787_v1 }
 0x49e   :  { %1073 = vmatpush1.bf16.msra.mxu0 %v1880_v17  ;;  %1114 = vmatpush1.bf16.msra.mxu1 %v1884_v18 }
 0x49f   :  { %1074 = vmatprep.subr.bf16.mxu0 %v1886_v19  ;;  %1115 = vmatprep.subr.bf16.mxu1 %v1890_v20 }
 0x4a2   :  { %1075 = vmatpush1.bf16.msra.mxu0 %v1894_v21  ;;  %1116 = vmatpush1.bf16.msra.mxu1 %v1896_v22 }
 0x4a3   :  { %1076 = vmatprep.subr.bf16.mxu0 %v1900_v23  ;;  %1117 = vmatprep.subr.bf16.mxu1 %v1904_v24 }
 0x4a6   :  { %1077 = vmatpush1.bf16.msra.mxu0 %v1906_v25  ;;  %1118 = vmatpush1.bf16.msra.mxu1 %v1910_v26 }
 0x4a7   :  { %1078 = vmatprep.subr.bf16.mxu0 %v1912_v27  ;;  %1119 = vmatprep.subr.bf16.mxu1 %v1916_v28 }
 0x4aa   :  { %1079 = vmatpush1.bf16.msra.mxu0 %v1918_v29  ;;  %1120 = vmatpush1.bf16.msra.mxu1 %v1920_v30 }
 0x4ab   :  { %1080 = vmatprep.subr.bf16.mxu0 %v1924_v31  ;;  %1121 = vmatprep.subr.bf16.mxu1 %v1928_v32 }
 0x4ae   :  { %1081 = vmatpush1.bf16.msra.mxu0 %v1932_v33  ;;  %1122 = vmatpush1.bf16.msra.mxu1 %v1934_v34 }
 0x4af   :  { %1082 = vmatprep.subr.bf16.mxu0 %v1938_v35  ;;  %1123 = vmatprep.subr.bf16.mxu1 %v1940_v36 }
 0x4b2   :  { %1083 = vmatpush1.bf16.msra.mxu0 %v1944_v37  ;;  %1124 = vmatpush1.bf16.msra.mxu1 %v1946_v38 }
 0x4b3   :  { %1084 = vmatprep.subr.bf16.mxu0 %v1950_v39  ;;  %1125 = vmatprep.subr.bf16.mxu1 %v1952_v40 }
 0x4b6   :  { %1085 = vmatpush1.bf16.msra.mxu0 %v1956_v41  ;;  %1126 = vmatpush1.bf16.msra.mxu1 %v1958_v42 }
 0x4b7   :  { %1205 = vmatprep.subr.bf16.mxu0 %v1866_v8  ;;  %1246 = vmatprep.subr.bf16.mxu1 %v1868_v10  ;;  %v933_v8 = vld [vmem:[#allocation2 + $0x4] ss:$8 sm:$0xf] }
 0x56c   :  { %v969_v3 = vpop.f32.mrb[20].mxu0  ;;  %v1010_v9 = vpop.f32.mrb[20].mxu1 }
 0x56d   :  { %v971_v11 = vpop.f32.mrb[21].mxu0  ;;  %v1012_v12 = vpop.f32.mrb[21].mxu1 }
 0x56e   :  { %v1021_v43 = vcombine.low %v969_v3, %v971_v11  ;;  %v1022_v45 = vcombine.low %v1010_v9, %v1012_v12  ;;  %v973_v46 = vpop.f32.mrb[22].mxu0  ;;  %v1014_v47 = vpop.f32.mrb[22].mxu1 }
 0x56f   :  { %v974_v48 = vpop.f32.mrb[23].mxu0  ;;  %v1015_v49 = vpop.f32.mrb[23].mxu1 }
 0x570   :  { %v1029_v50 = vrot.slane %v1021_v43, %v2005_v6  ;;  %v1036_v51 = vrot.slane %v1022_v45, %v2005_v6 }
 0x572   :  { %v1037_v52 = vcombine.low %v1029_v50, %v1036_v51 }
 0x574   :  { %v1044_v53 = vrot.slane %v1037_v52, %v2005_v6 }
 0x576   :  { %v1046_v54 = vadd.f32 %v1044_v53, %v933_v8  ;;  %v1672_v8 = vld [vmem:[#allocation9] ss:$16 sps:$4 sm:$0xff]  }
 0x578   :  { %v1542_v10 = vmul.f32 -1.442695, %v1046_v54  ;;  %v1054_v56 = vrot.slane %v1046_v54, 3  ;;  %v1673_v54 = vld [vmem:[#allocation9 + $0x8] ss:$16 sps:$4 sm:$0xff]  }
 0x57a   :  { %1638 = vpow2.f32 %v1542_v10  ;;  %v1674_v10 = vld [vmem:[#allocation9 + $0x24] ss:$16 sps:$4 sm:$0xff]  }
 0x584   :  { %v1639_v44 = vpop.eup %1638 }
 0x585   :  { %v1050_v55 = vadd.f32 1.0, %v1639_v44  ;;  %v1675_v44 = vld [vmem:[#allocation9 + $0x2c] ss:$16 sps:$4 sm:$0xff]  }
 0x587   :  { %1640 = vrcp.f32 %v1050_v55  ;;  %v1676_v55 = vld [vmem:[#allocation9 + $0x20] ss:$16 sps:$4 sm:$0xff]  }
 0x588   :  { %1642 = vtanh.f32 %v1054_v56  ;;  %v1677_v56 = vld [vmem:[#allocation9 + $0x28] ss:$16 sps:$4 sm:$0xff]  }
 0x591   :  { %v1641_v57 = vpop.eup %1640 }
 0x592   :  { %v1058_v58 = vrot.slane %v1641_v57, 1  ;;  %v1643_v59 = vpop.eup %1642  ;;  %v1064_v63 = vrot.slane %v1641_v57, 2 }
 0x593   :  { %v1061_v60 = vmul.f32 %v1643_v59, %v1641_v57  ;;  %v1678_v57 = vld [vmem:[#allocation9 + $0x44] ss:$16 sps:$4 sm:$0xff]   ;;  %v1680_v59 = vld [vmem:[#allocation9 + $0x40] ss:$16 sps:$4 sm:$0xff]  }
 0x594   :  { %v1060_v61 = vmul.f32 %v1058_v58, %v2133_v4  ;;  %v1068_v4 = vld [vmem:[#allocation2 + $0x5] ss:$8 sm:$0xf]  ;;  %v1679_v58 = vld [vmem:[#allocation9 + $0x4c] ss:$16 sps:$4 sm:$0xff]  }
 0x596   :  { %v2174_v62 = vadd.f32 %v1061_v60, %v1060_v61  ;;  %v1681_v60 = vld [vmem:[#allocation9 + $0x48] ss:$16 sps:$4 sm:$0xff]   ;;  %v1682_v61 = vld [vmem:[#allocation9 + $0x64] ss:$16 sps:$4 sm:$0xff]  }
 0x598   :  { %1644 = vtanh.f32 %v2174_v62 }
 0x5a2   :  { %v1645_v5 = vpop.eup %1644 }
 0x5a3   :  { %v1066_v7 = vmul.f32 %v1645_v5, %v1064_v63  ;;  %v1684_v63 = vld [vmem:[#allocation9 + $0x60] ss:$16 sps:$4 sm:$0xff]   ;;  %v1685_v5 = vld [vmem:[#allocation9 + $0x68] ss:$16 sps:$4 sm:$0xff]  }
 0x5a5   :  { %v1069_v0 = vpack.c.bf16 %v1066_v7, %v1066_v7  ;;  %v1687_v7 = vld [vmem:[#allocation9 + $0x8c] ss:$16 sps:$4 sm:$0xff]  }
 0x5a7   :  { %1103 = vmatmul.mubr.bf16.vlgmr.msra.gmra.mrb[24].mxu0 %v1069_v0  ;;  %1144 = vmatmul.mubr.bf16.vlgmr.msra.gmra.mrb[24].mxu1 %v1069_v0 }
 0x5a8   :  { %1206 = vmatpush1.bf16.msra.mxu0 %v1870_v13  ;;  %1247 = vmatpush1.bf16.msra.mxu1 %v1872_v14  ;;  %v1670_v13 = vld [vmem:[#allocation9 + $0x4] ss:$16 sps:$4 sm:$0xff]   ;;  %v1671_v14 = vld [vmem:[#allocation9 + $0xc] ss:$16 sps:$4 sm:$0xff]  }
 0x5a9   :  { %1207 = vmatprep.subr.bf16.mxu0 %v1874_v15  ;;  %1248 = vmatprep.subr.bf16.mxu1 %v1878_v16 }
 0x5aa   :  { %1237 = vmatprep.mubr.bf16.mxu0 %v1787_v1  ;;  %1278 = vmatprep.mubr.bf16.mxu1 %v1787_v1 }
 0x5ac   :  { %1208 = vmatpush1.bf16.msra.mxu0 %v1880_v17  ;;  %1249 = vmatpush1.bf16.msra.mxu1 %v1884_v18 }
 0x5ad   :  { %1209 = vmatprep.subr.bf16.mxu0 %v1886_v19  ;;  %1250 = vmatprep.subr.bf16.mxu1 %v1890_v20 }
 0x5b0   :  { %1210 = vmatpush1.bf16.msra.mxu0 %v1894_v21  ;;  %1251 = vmatpush1.bf16.msra.mxu1 %v1896_v22 }
 0x5b1   :  { %1211 = vmatprep.subr.bf16.mxu0 %v1900_v23  ;;  %1252 = vmatprep.subr.bf16.mxu1 %v1904_v24 }
 0x5b4   :  { %1212 = vmatpush1.bf16.msra.mxu0 %v1906_v25  ;;  %1253 = vmatpush1.bf16.msra.mxu1 %v1910_v26 }
 0x5b5   :  { %1213 = vmatprep.subr.bf16.mxu0 %v1912_v27  ;;  %1254 = vmatprep.subr.bf16.mxu1 %v1916_v28 }
 0x5b8   :  { %1214 = vmatpush1.bf16.msra.mxu0 %v1918_v29  ;;  %1255 = vmatpush1.bf16.msra.mxu1 %v1920_v30 }
 0x5b9   :  { %1215 = vmatprep.subr.bf16.mxu0 %v1924_v31  ;;  %1256 = vmatprep.subr.bf16.mxu1 %v1928_v32 }
 0x5bc   :  { %1216 = vmatpush1.bf16.msra.mxu0 %v1932_v33  ;;  %1257 = vmatpush1.bf16.msra.mxu1 %v1934_v34 }
 0x5bd   :  { %1217 = vmatprep.subr.bf16.mxu0 %v1938_v35  ;;  %1258 = vmatprep.subr.bf16.mxu1 %v1940_v36 }
 0x5c0   :  { %1218 = vmatpush1.bf16.msra.mxu0 %v1944_v37  ;;  %1259 = vmatpush1.bf16.msra.mxu1 %v1946_v38 }
 0x5c1   :  { %1219 = vmatprep.subr.bf16.mxu0 %v1950_v39  ;;  %1260 = vmatprep.subr.bf16.mxu1 %v1952_v40 }
 0x5c4   :  { %1220 = vmatpush1.bf16.msra.mxu0 %v1956_v41  ;;  %1261 = vmatpush1.bf16.msra.mxu1 %v1958_v42 }
 0x5c5   :  { %1340 = vmatprep.subr.bf16.mxu0 %v1670_v13  ;;  %1381 = vmatprep.subr.bf16.mxu1 %v1671_v14 }
 0x67a   :  { %v1104_v15 = vpop.f32.mrb[24].mxu0  ;;  %v1145_v16 = vpop.f32.mrb[24].mxu1 }
 0x67b   :  { %v1106_v17 = vpop.f32.mrb[25].mxu0  ;;  %v1147_v18 = vpop.f32.mrb[25].mxu1 }
 0x67c   :  { %v1156_v19 = vcombine.low %v1104_v15, %v1106_v17  ;;  %v1157_v20 = vcombine.low %v1145_v16, %v1147_v18  ;;  %v1108_v21 = vpop.f32.mrb[26].mxu0  ;;  %v1149_v22 = vpop.f32.mrb[26].mxu1 }
 0x67d   :  { %v1109_v23 = vpop.f32.mrb[27].mxu0  ;;  %v1150_v24 = vpop.f32.mrb[27].mxu1 }
 0x67e   :  { %v1164_v25 = vrot.slane %v1156_v19, %v2005_v6  ;;  %v1171_v26 = vrot.slane %v1157_v20, %v2005_v6 }
 0x680   :  { %v1172_v27 = vcombine.low %v1164_v25, %v1171_v26 }
 0x682   :  { %v1179_v28 = vrot.slane %v1172_v27, %v2005_v6 }
 0x684   :  { %v1181_v2 = vadd.f32 %v1179_v28, %v1068_v4 }
 0x686   :  { %v1543_v3 = vmul.f32 -1.442695, %v1181_v2  ;;  %v1189_v12 = vrot.slane %v1181_v2, 3 }
 0x688   :  { %1646 = vpow2.f32 %v1543_v3 }
 0x692   :  { %v1647_v9 = vpop.eup %1646 }
 0x693   :  { %v1185_v11 = vadd.f32 1.0, %v1647_v9 }
 0x695   :  { %1648 = vrcp.f32 %v1185_v11 }
 0x696   :  { %1650 = vtanh.f32 %v1189_v12 }
 0x69f   :  { %v1649_v43 = vpop.eup %1648 }
 0x6a0   :  { %v1193_v45 = vrot.slane %v1649_v43, 1  ;;  %v1651_v46 = vpop.eup %1650  ;;  %v1199_v50 = vrot.slane %v1649_v43, 2 }
 0x6a1   :  { %v1196_v47 = vmul.f32 %v1651_v46, %v1649_v43 }
 0x6a2   :  { %v1195_v48 = vmul.f32 %v1193_v45, %v2174_v62  ;;  %v1683_v62 = vld [vmem:[#allocation9 + $0x6c] ss:$16 sps:$4 sm:$0xff]  }
 0x6a4   :  { %v2213_v49 = vadd.f32 %v1196_v47, %v1195_v48 }
 0x6a6   :  { %1652 = vtanh.f32 %v2213_v49 }
 0x6b0   :  { %v1653_v51 = vpop.eup %1652 }
 0x6b1   :  { %v1201_v52 = vmul.f32 %v1653_v51, %v1199_v50  ;;  %v1338_v51 = vld [vmem:[#allocation2 + $0x7] ss:$8 sm:$0xf] }
 0x6b3   :  { %v1204_v53 = vpack.c.bf16 %v1201_v52, %v1201_v52 }
 0x6b5   :  { %1238 = vmatmul.mubr.bf16.vlgmr.msra.gmra.mrb[28].mxu0 %v1204_v53  ;;  %1279 = vmatmul.mubr.bf16.vlgmr.msra.gmra.mrb[28].mxu1 %v1204_v53 }
 0x6b6   :  { %1341 = vmatpush1.bf16.msra.mxu0 %v1672_v8  ;;  %1382 = vmatpush1.bf16.msra.mxu1 %v1673_v54 }
 0x6b7   :  { %1342 = vmatprep.subr.bf16.mxu0 %v1674_v10  ;;  %1383 = vmatprep.subr.bf16.mxu1 %v1675_v44 }
 0x6b8   :  { %1372 = vmatprep.mubr.bf16.mxu0 %v1787_v1  ;;  %1413 = vmatprep.mubr.bf16.mxu1 %v1787_v1  ;;  %v1686_v1 = vld [vmem:[#allocation9 + $0x84] ss:$16 sps:$4 sm:$0xff]  }
 0x6ba   :  { %1343 = vmatpush1.bf16.msra.mxu0 %v1676_v55  ;;  %1384 = vmatpush1.bf16.msra.mxu1 %v1677_v56 }
 0x6bb   :  { %1344 = vmatprep.subr.bf16.mxu0 %v1678_v57  ;;  %1385 = vmatprep.subr.bf16.mxu1 %v1679_v58 }
 0x6be   :  { %1345 = vmatpush1.bf16.msra.mxu0 %v1680_v59  ;;  %1386 = vmatpush1.bf16.msra.mxu1 %v1681_v60 }
 0x6bf   :  { %1346 = vmatprep.subr.bf16.mxu0 %v1682_v61  ;;  %1387 = vmatprep.subr.bf16.mxu1 %v1683_v62 }
 0x6c2   :  { %1347 = vmatpush1.bf16.msra.mxu0 %v1684_v63  ;;  %1388 = vmatpush1.bf16.msra.mxu1 %v1685_v5 }
 0x6c3   :  { %1348 = vmatprep.subr.bf16.mxu0 %v1686_v1  ;;  %1389 = vmatprep.subr.bf16.mxu1 %v1687_v7  ;;  %v1478_v1 = vld [vmem:[#allocation3] sm:$0x1] }
 0x6c6   :  { %1349 = vmatpush1.bf16.msra.mxu0 %v1918_v29  ;;  %1390 = vmatpush1.bf16.msra.mxu1 %v1920_v30 }
 0x6c7   :  { %1350 = vmatprep.subr.bf16.mxu0 %v1924_v31  ;;  %1391 = vmatprep.subr.bf16.mxu1 %v1928_v32 }
 0x6ca   :  { %1351 = vmatpush1.bf16.msra.mxu0 %v1932_v33  ;;  %1392 = vmatpush1.bf16.msra.mxu1 %v1934_v34 }
 0x6cb   :  { %1352 = vmatprep.subr.bf16.mxu0 %v1938_v35  ;;  %1393 = vmatprep.subr.bf16.mxu1 %v1940_v36 }
 0x6ce   :  { %1353 = vmatpush1.bf16.msra.mxu0 %v1944_v37  ;;  %1394 = vmatpush1.bf16.msra.mxu1 %v1946_v38 }
 0x6cf   :  { %1354 = vmatprep.subr.bf16.mxu0 %v1950_v39  ;;  %1395 = vmatprep.subr.bf16.mxu1 %v1952_v40 }
 0x6d2   :  { %1355 = vmatpush1.bf16.msra.mxu0 %v1956_v41  ;;  %1396 = vmatpush1.bf16.msra.mxu1 %v1958_v42  ;;  %v1203_v41 = vld [vmem:[#allocation2 + $0x6] ss:$8 sm:$0xf] }
 0x788   :  { %v1239_v29 = vpop.f32.mrb[28].mxu0  ;;  %v1280_v30 = vpop.f32.mrb[28].mxu1 }
 0x789   :  { %v1241_v31 = vpop.f32.mrb[29].mxu0  ;;  %v1282_v32 = vpop.f32.mrb[29].mxu1 }
 0x78a   :  { %v1291_v33 = vcombine.low %v1239_v29, %v1241_v31  ;;  %v1292_v34 = vcombine.low %v1280_v30, %v1282_v32  ;;  %v1243_v35 = vpop.f32.mrb[30].mxu0  ;;  %v1284_v36 = vpop.f32.mrb[30].mxu1 }
 0x78b   :  { %v1244_v0 = vpop.f32.mrb[31].mxu0  ;;  %v1285_v37 = vpop.f32.mrb[31].mxu1 }
 0x78c   :  { %v1299_v38 = vrot.slane %v1291_v33, %v2005_v6  ;;  %v1306_v39 = vrot.slane %v1292_v34, %v2005_v6 }
 0x78e   :  { %v1307_v13 = vcombine.low %v1299_v38, %v1306_v39 }
 0x790   :  { %v1314_v40 = vrot.slane %v1307_v13, %v2005_v6 }
 0x792   :  { %v1316_v14 = vadd.f32 %v1314_v40, %v1203_v41 }
 0x794   :  { %v1544_v42 = vmul.f32 -1.442695, %v1316_v14  ;;  %v1324_v17 = vrot.slane %v1316_v14, 3 }
 0x796   :  { %1654 = vpow2.f32 %v1544_v42 }
 0x7a0   :  { %v1655_v15 = vpop.eup %1654 }
 0x7a1   :  { %v1320_v16 = vadd.f32 1.0, %v1655_v15 }
 0x7a3   :  { %1656 = vrcp.f32 %v1320_v16 }
 0x7a4   :  { %1658 = vtanh.f32 %v1324_v17 }
 0x7ad   :  { %v1657_v18 = vpop.eup %1656 }
 0x7ae   :  { %v1328_v19 = vrot.slane %v1657_v18, 1  ;;  %v1659_v20 = vpop.eup %1658  ;;  %v1334_v24 = vrot.slane %v1657_v18, 2 }
 0x7af   :  { %v1331_v21 = vmul.f32 %v1659_v20, %v1657_v18 }
 0x7b0   :  { %v1330_v22 = vmul.f32 %v1328_v19, %v2213_v49 }
 0x7b2   :  { %v1332_v23 = vadd.f32 %v1331_v21, %v1330_v22 }
 0x7b4   :  { %1660 = vtanh.f32 %v1332_v23 }
 0x7be   :  { %v1661_v25 = vpop.eup %1660 }
 0x7bf   :  { %v1336_v26 = vmul.f32 %v1661_v25, %v1334_v24 }
 0x7c1   :  { %v1339_v27 = vpack.c.bf16 %v1336_v26, %v1336_v26 }
 0x7c3   :  { %1373 = vmatmul.mubr.bf16.vlgmr.msra.gmra.mrb[32].mxu0 %v1339_v27  ;;  %1414 = vmatmul.mubr.bf16.vlgmr.msra.gmra.mrb[32].mxu1 %v1339_v27 }
 0x896   :  { %v1374_v28 = vpop.f32.mrb[32].mxu0  ;;  %v1415_v4 = vpop.f32.mrb[32].mxu1 }
 0x897   :  { %v1376_v2 = vpop.f32.mrb[33].mxu0  ;;  %v1417_v3 = vpop.f32.mrb[33].mxu1 }
 0x898   :  { %v1426_v9 = vcombine.low %v1374_v28, %v1376_v2  ;;  %v1427_v11 = vcombine.low %v1415_v4, %v1417_v3  ;;  %v1378_v12 = vpop.f32.mrb[34].mxu0  ;;  %v1419_v43 = vpop.f32.mrb[34].mxu1 }
 0x899   :  { %v1379_v45 = vpop.f32.mrb[35].mxu0  ;;  %v1420_v46 = vpop.f32.mrb[35].mxu1 }
 0x89a   :  { %v1434_v47 = vrot.slane %v1426_v9, %v2005_v6  ;;  %v1441_v48 = vrot.slane %v1427_v11, %v2005_v6 }
 0x89c   :  { %v1442_v49 = vcombine.low %v1434_v47, %v1441_v48 }
 0x89e   :  { %v1449_v50 = vrot.slane %v1442_v49, %v2005_v6  ;;  %v1472_v6 = vld [vmem:[%s2258_s4] sm:$0x1] }
 0x8a0   :  { %v1451_v52 = vadd.f32 %v1449_v50, %v1338_v51 }
 0x8a2   :  { %v1545_v53 = vmul.f32 -1.442695, %v1451_v52  ;;  %v1459_v10 = vrot.slane %v1451_v52, 3 }
 0x8a4   :  { %1662 = vpow2.f32 %v1545_v53 }
 0x8ae   :  { %v1663_v8 = vpop.eup %1662 }
 0x8af   :  { %v1455_v54 = vadd.f32 1.0, %v1663_v8 }
 0x8b1   :  { %1664 = vrcp.f32 %v1455_v54 }
 0x8b2   :  { %1666 = vtanh.f32 %v1459_v10 }
 0x8bb   :  { %v1665_v44 = vpop.eup %1664 }
 0x8bc   :  { %v1463_v55 = vrot.slane %v1665_v44, 1  ;;  %v1667_v56 = vpop.eup %1666  ;;  %v1469_v60 = vrot.slane %v1665_v44, 2 }
 0x8bd   :  { %v1466_v58 = vmul.f32 %v1667_v56, %v1665_v44 }
 0x8be   :  { %v1465_v57 = vmul.f32 %v1463_v55, %v1332_v23 }
 0x8c0   :  { %v1467_v59 = vadd.f32 %v1466_v58, %v1465_v57 }
 0x8c2   :  { %1668 = vtanh.f32 %v1467_v59 }
 0x8cc   :  { %v1669_v61 = vpop.eup %1668 }
 0x8cd   :  { %v1471_v62 = vmul.f32 %v1669_v61, %v1469_v60 }
 0x8cf   :  { %v1473_v63 = vmul.f32 %v1472_v6, %v1471_v62 }
 0x8d1   :  { %v1475_v5 = vsel %vm1474_vm2, %v1473_v63, 0.0 }
 0x8d2   :  { %1476 = vadd.xlane.f32.xlu0 %v1475_v5 }
 0x95f   :  { %v1477_v7 = vpop.xlane.xlu0 %1476 }
 0x960   :  { %v1479_v29 = vadd.f32 %v1478_v1, %v1477_v7 }
 0x962   :  { %1481 = vst.msk [vmem:[#allocation10] sm:$0x1] %vm1480_vm3, %v1479_v29 }
 0x963   :  { %1765 = shalt.err (!%p1762_p0)
}
 0x964   :  { %s1766_s16 = scalar_lea.hbm %s2260_s6, 16 }
 0x965   :  { %p1767_p1 = scmp.ne.s32.totalorder %s2260_s6, %s1766_s16  ;;  %p1770_p2 = scmp.lt.u32.totalorder %s1766_s16, %s2260_s6 }
 0x967   :  { %p1772_p3 = pnand %p1770_p2, %p1767_p1 }
 0x969   :  { %1775 = shalt.err (!%p1772_p3)
}
 0x96a   :  { %1491 = dma.vmem_to_hbm [thread:$0]  %s1489_s12, 16, %s2260_s6, [#allocation6]  }
 0x96b   :  { %1780 = dma.done.wait [#allocation6], 16  }
 0x96c   :  { %1781 = vsyncadd [#allocation6], 4294967280 }
 0x96d   :  { %1495 = vsyncpa [#allocation5], 1 }
 0x96e   :  { %1496 = vsyncpa [#allocation8], 1 }
 0x96f   :  { %1497 = vsyncpa [#allocation6], 1 }

</bundles_post_ra>
